<compile_context>
chip_gen: v5e
topology: v5e:2x2
jax: 0.10.0
libtpu: 0.0.40
codegen_flags: <defaults>
</compile_context>

<pallas_src>
import jax
import jax.numpy as jnp
from jax.experimental import pallas as pl
from jax.experimental.pallas import tpu as pltpu

IN = 784          # 28 * 28
IN_PAD = 896      # 7 * 128 lane-aligned contraction dim for layer 1
H1 = 512
H2 = 256


def _round_up(n: int, m: int) -> int:
    return ((n + m - 1) // m) * m


def _disc_kernel(x_ref, w1_ref, b1_ref, w2_ref, b2_ref, w3_ref, b3_ref, o_ref):
    # fc1 (bf16 MXU, f32 accumulate) + bias + leaky_relu(0.2) in f32
    h1 = jnp.dot(x_ref[...], w1_ref[...], preferred_element_type=jnp.float32)
    h1 = h1 + b1_ref[...]
    h1 = jnp.where(h1 > 0, h1, 0.2 * h1)

    # fc2 (bf16 MXU, f32 accumulate) + bias + leaky_relu(0.2) in f32
    h2 = jnp.dot(h1.astype(jnp.bfloat16), w2_ref[...],
                 preferred_element_type=jnp.float32)
    h2 = h2 + b2_ref[...]
    h2 = jnp.where(h2 > 0, h2, 0.2 * h2)

    # fc3: single output neuron -> VPU multiply + XLU lane reduction (no MXU pass,
    # no 128-wide padded writeback), then sigmoid in f32.
    z = jnp.sum(h2 * w3_ref[...], axis=-1, keepdims=True) + b3_ref[...]
    o_ref[...] = jax.nn.sigmoid(z).astype(o_ref.dtype)


def prepare_discriminator_params(params):
    """One-time preprocessing: transpose to [in, out], pad K to 896, cast matmul
    operands to bf16. Biases and the fc3 row stay f32 (VPU math is f32)."""
    w1 = jnp.pad(params["w1"].T.astype(jnp.bfloat16),
                 ((0, IN_PAD - IN), (0, 0)))                 # (896, 512) bf16
    w2 = params["w2"].T.astype(jnp.bfloat16)                 # (512, 256) bf16
    w3 = params["w3"].astype(jnp.float32).reshape(1, H2)     # (1, 256)   f32
    b1 = params["b1"].astype(jnp.float32).reshape(1, H1)     # (1, 512)   f32
    b2 = params["b2"].astype(jnp.float32).reshape(1, H2)     # (1, 256)   f32
    b3 = params["b3"].astype(jnp.float32).reshape(1, 1)      # (1, 1)     f32
    return {"w1": w1, "b1": b1, "w2": w2, "b2": b2, "w3": w3, "b3": b3}


def my_discriminator_forward(x, prepped, *, tb: int = 512):
    """x: [B, 784] float32. prepped: output of prepare_discriminator_params."""
    B = x.shape[0]
    TB = min(tb, _round_up(B, 8))          # batch tile (multiple of 8 sublanes)
    B_pad = _round_up(B, TB)
    n_tiles = B_pad // TB

    # Cast to bf16 for the MXU and pad batch + K dims in one shot.
    x_p = jnp.pad(x.astype(jnp.bfloat16),
                  ((0, B_pad - B), (0, IN_PAD - IN)))        # (B_pad, 896) bf16

    out_padded = pl.pallas_call(
        _disc_kernel,
        out_shape=jax.ShapeDtypeStruct((B_pad, 1), jnp.float32),
        grid_spec=pltpu.PrefetchScalarGridSpec(
            num_scalar_prefetch=0,
            grid=(n_tiles,),
            in_specs=[
                pl.BlockSpec((TB, IN_PAD), lambda i: (i, 0)),   # x tile (pipelined)
                pl.BlockSpec((IN_PAD, H1), lambda i: (0, 0)),   # w1 (resident)
                pl.BlockSpec((1, H1), lambda i: (0, 0)),        # b1
                pl.BlockSpec((H1, H2), lambda i: (0, 0)),       # w2 (resident)
                pl.BlockSpec((1, H2), lambda i: (0, 0)),        # b2
                pl.BlockSpec((1, H2), lambda i: (0, 0)),        # w3 row
                pl.BlockSpec((1, 1), lambda i: (0, 0)),         # b3
            ],
            out_specs=pl.BlockSpec((TB, 1), lambda i: (i, 0)),
        ),
        compiler_params=pltpu.CompilerParams(
            dimension_semantics=("parallel",)),
    )(x_p, prepped["w1"], prepped["b1"], prepped["w2"], prepped["b2"],
      prepped["w3"], prepped["b3"])

    return out_padded[:B]   # (B, 1); no-op when B == B_pad


def _init_params(key):
    """Deterministic synthetic parameters with PyTorch nn.Linear shapes."""
    ks = jax.random.split(key, 6)
    scale = 0.05
    return {
        "w1": scale * jax.random.normal(ks[0], (H1, IN), jnp.float32),
        "b1": scale * jax.random.normal(ks[1], (H1,), jnp.float32),
        "w2": scale * jax.random.normal(ks[2], (H2, H1), jnp.float32),
        "b2": scale * jax.random.normal(ks[3], (H2,), jnp.float32),
        "w3": scale * jax.random.normal(ks[4], (1, H2), jnp.float32),
        "b3": scale * jax.random.normal(ks[5], (1,), jnp.float32),
    }


def _reference_forward(x, p):
    h1 = x @ p["w1"].T + p["b1"]
    h1 = jnp.where(h1 > 0, h1, 0.2 * h1)
    h2 = h1 @ p["w2"].T + p["b2"]
    h2 = jnp.where(h2 > 0, h2, 0.2 * h2)
    z = h2 @ p["w3"].T + p["b3"]
    return jax.nn.sigmoid(z)


if __name__ == "__main__":
    key = jax.random.PRNGKey(0)
    kx, kp = jax.random.split(key)

    params = _init_params(kp)
    prepped = prepare_discriminator_params(params)   # one-time preprocessing

    # Small single-tile case (B=8 -> TB=8, grid=(1,)).
    B = 8
    x = jax.random.normal(kx, (B, IN), jnp.float32)
    out = jax.block_until_ready(my_discriminator_forward(x, prepped))
    ref = _reference_forward(x, params)
    assert out.shape == (B, 1)
    assert jnp.allclose(out, ref, atol=1e-2, rtol=1e-2), "mismatch vs. reference (B=8)"

    # Multi-tile case exercising the batch grid + padding (B=260, TB=128 -> grid=(3,)).
    B2 = 260
    x2 = jax.random.normal(jax.random.PRNGKey(1), (B2, IN), jnp.float32)
    out2 = jax.block_until_ready(my_discriminator_forward(x2, prepped, tb=128))
    ref2 = _reference_forward(x2, params)
    assert out2.shape == (B2, 1)
    assert jnp.allclose(out2, ref2, atol=1e-2, rtol=1e-2), "mismatch vs. reference (B=260)"

    print("KERNEL_OK")
</pallas_src>

<mosaic_0001>
module attributes {stable_mosaic.version = 11 : i64} {
  func.func @_disc_kernel(%arg0: i32, %arg1: memref<8x896xbf16, #tpu.memory_space<vmem>>, %arg2: memref<896x512xbf16, #tpu.memory_space<vmem>>, %arg3: memref<1x512xf32, #tpu.memory_space<vmem>>, %arg4: memref<512x256xbf16, #tpu.memory_space<vmem>>, %arg5: memref<1x256xf32, #tpu.memory_space<vmem>>, %arg6: memref<1x256xf32, #tpu.memory_space<vmem>>, %arg7: memref<1x1xf32, #tpu.memory_space<vmem>>, %arg8: memref<8x1xf32, #tpu.memory_space<vmem>>) attributes {dimension_semantics = [#tpu.dimension_semantics<parallel>], iteration_bounds = array<i64: 1>, scalar_prefetch = 0 : i64, scratch_operands = 0 : i64, tpu.core_type = #tpu.core_type<tc>, window_params = [{transform_indices = @transform_0, window_bounds = array<i64: 8, 896>}, {pipeline_mode = #tpu.pipeline_mode<synchronous>, transform_indices = @transform_1, window_bounds = array<i64: 896, 512>}, {pipeline_mode = #tpu.pipeline_mode<synchronous>, transform_indices = @transform_2, window_bounds = array<i64: 1, 512>}, {pipeline_mode = #tpu.pipeline_mode<synchronous>, transform_indices = @transform_3, window_bounds = array<i64: 512, 256>}, {pipeline_mode = #tpu.pipeline_mode<synchronous>, transform_indices = @transform_4, window_bounds = array<i64: 1, 256>}, {pipeline_mode = #tpu.pipeline_mode<synchronous>, transform_indices = @transform_5, window_bounds = array<i64: 1, 256>}, {pipeline_mode = #tpu.pipeline_mode<synchronous>, transform_indices = @transform_6, window_bounds = array<i64: 1, 1>}, {transform_indices = @transform_7, window_bounds = array<i64: 8, 1>}]} {
    %c0 = arith.constant 0 : index
    %c0_0 = arith.constant 0 : index
    %0 = vector.load %arg1[%c0, %c0_0] : memref<8x896xbf16, #tpu.memory_space<vmem>>, vector<8x896xbf16>
    %c0_1 = arith.constant 0 : index
    %c0_2 = arith.constant 0 : index
    %1 = vector.load %arg2[%c0_1, %c0_2] : memref<896x512xbf16, #tpu.memory_space<vmem>>, vector<896x512xbf16>
    %cst = arith.constant dense<0.000000e+00> : vector<8x512xf32>
    %2 = tpu.matmul %0, %1, %cst {dimension_numbers = #tpu.dot_dimension_numbers<[1], [0], [0], [1], [0, 0, 1, 1], [], []>} : vector<8x896xbf16>, vector<896x512xbf16>, vector<8x512xf32> -> vector<8x512xf32>
    %c0_3 = arith.constant 0 : index
    %c0_4 = arith.constant 0 : index
    %3 = vector.load %arg3[%c0_3, %c0_4] : memref<1x512xf32, #tpu.memory_space<vmem>>, vector<1x512xf32>
    %4 = vector.broadcast %3 : vector<1x512xf32> to vector<8x512xf32>
    %5 = arith.addf %2, %4 : vector<8x512xf32>
    %cst_5 = arith.constant 0.000000e+00 : f32
    %6 = vector.broadcast %cst_5 : f32 to vector<8x512xf32>
    %7 = arith.cmpf ogt, %5, %6 : vector<8x512xf32>
    %cst_6 = arith.constant 2.000000e-01 : f32
    %8 = vector.broadcast %cst_6 : f32 to vector<8x512xf32>
    %9 = arith.mulf %8, %5 : vector<8x512xf32>
    %10 = arith.select %7, %5, %9 : vector<8x512xi1>, vector<8x512xf32>
    %11 = arith.truncf %10 : vector<8x512xf32> to vector<8x512xbf16>
    %c0_7 = arith.constant 0 : index
    %c0_8 = arith.constant 0 : index
    %12 = vector.load %arg4[%c0_7, %c0_8] : memref<512x256xbf16, #tpu.memory_space<vmem>>, vector<512x256xbf16>
    %cst_9 = arith.constant dense<0.000000e+00> : vector<8x256xf32>
    %13 = tpu.matmul %11, %12, %cst_9 {dimension_numbers = #tpu.dot_dimension_numbers<[1], [0], [0], [1], [0, 0, 1, 1], [], []>} : vector<8x512xbf16>, vector<512x256xbf16>, vector<8x256xf32> -> vector<8x256xf32>
    %c0_10 = arith.constant 0 : index
    %c0_11 = arith.constant 0 : index
    %14 = vector.load %arg5[%c0_10, %c0_11] : memref<1x256xf32, #tpu.memory_space<vmem>>, vector<1x256xf32>
    %15 = vector.broadcast %14 : vector<1x256xf32> to vector<8x256xf32>
    %16 = arith.addf %13, %15 : vector<8x256xf32>
    %cst_12 = arith.constant 0.000000e+00 : f32
    %17 = vector.broadcast %cst_12 : f32 to vector<8x256xf32>
    %18 = arith.cmpf ogt, %16, %17 : vector<8x256xf32>
    %cst_13 = arith.constant 2.000000e-01 : f32
    %19 = vector.broadcast %cst_13 : f32 to vector<8x256xf32>
    %20 = arith.mulf %19, %16 : vector<8x256xf32>
    %21 = arith.select %18, %16, %20 : vector<8x256xi1>, vector<8x256xf32>
    %c0_14 = arith.constant 0 : index
    %c0_15 = arith.constant 0 : index
    %22 = vector.load %arg6[%c0_14, %c0_15] : memref<1x256xf32, #tpu.memory_space<vmem>>, vector<1x256xf32>
    %23 = vector.broadcast %22 : vector<1x256xf32> to vector<8x256xf32>
    %24 = arith.mulf %21, %23 : vector<8x256xf32>
    %cst_16 = arith.constant dense<0.000000e+00> : vector<8xf32>
    %25 = vector.multi_reduction <add>, %24, %cst_16 [1] : vector<8x256xf32> to vector<8xf32>
    %26 = vector.shape_cast %25 : vector<8xf32> to vector<8x1xf32>
    %c0_17 = arith.constant 0 : index
    %c0_18 = arith.constant 0 : index
    %27 = vector.load %arg7[%c0_17, %c0_18] : memref<1x1xf32, #tpu.memory_space<vmem>>, vector<1x1xf32>
    %28 = vector.broadcast %27 : vector<1x1xf32> to vector<8x1xf32>
    %29 = arith.addf %26, %28 : vector<8x1xf32>
    %30 = arith.negf %29 : vector<8x1xf32>
    %31 = math.exp %30 : vector<8x1xf32>
    %cst_19 = arith.constant 1.000000e+00 : f32
    %32 = vector.broadcast %cst_19 : f32 to vector<8x1xf32>
    %33 = arith.addf %32, %31 : vector<8x1xf32>
    %34 = arith.divf %32, %33 : vector<8x1xf32>
    %c0_20 = arith.constant 0 : index
    %c0_21 = arith.constant 0 : index
    %35 = vector.load %arg8[%c0_20, %c0_21] : memref<8x1xf32, #tpu.memory_space<vmem>>, vector<8x1xf32>
    tpu.vector_store %arg8[%c0_20, %c0_21], %34 {strides = array<i32>} : memref<8x1xf32, #tpu.memory_space<vmem>>, vector<8x1xf32>,
    return
  }
  func.func @transform_0(%arg0: i32) -> (i32, i32) {
    %c0_i32 = arith.constant 0 : i32
    %c0_i32_0 = arith.constant 0 : i32
    return %arg0, %c0_i32 : i32, i32
  }
  func.func @transform_1(%arg0: i32) -> (i32, i32) {
    %c0_i32 = arith.constant 0 : i32
    %c0_i32_0 = arith.constant 0 : i32
    %c0_i32_1 = arith.constant 0 : i32
    return %c0_i32, %c0_i32_0 : i32, i32
  }
  func.func @transform_2(%arg0: i32) -> (i32, i32) {
    %c0_i32 = arith.constant 0 : i32
    %c0_i32_0 = arith.constant 0 : i32
    %c0_i32_1 = arith.constant 0 : i32
    return %c0_i32, %c0_i32_0 : i32, i32
  }
  func.func @transform_3(%arg0: i32) -> (i32, i32) {
    %c0_i32 = arith.constant 0 : i32
    %c0_i32_0 = arith.constant 0 : i32
    %c0_i32_1 = arith.constant 0 : i32
    return %c0_i32, %c0_i32_0 : i32, i32
  }
  func.func @transform_4(%arg0: i32) -> (i32, i32) {
    %c0_i32 = arith.constant 0 : i32
    %c0_i32_0 = arith.constant 0 : i32
    %c0_i32_1 = arith.constant 0 : i32
    return %c0_i32, %c0_i32_0 : i32, i32
  }
  func.func @transform_5(%arg0: i32) -> (i32, i32) {
    %c0_i32 = arith.constant 0 : i32
    %c0_i32_0 = arith.constant 0 : i32
    %c0_i32_1 = arith.constant 0 : i32
    return %c0_i32, %c0_i32_0 : i32, i32
  }
  func.func @transform_6(%arg0: i32) -> (i32, i32) {
    %c0_i32 = arith.constant 0 : i32
    %c0_i32_0 = arith.constant 0 : i32
    %c0_i32_1 = arith.constant 0 : i32
    return %c0_i32, %c0_i32_0 : i32, i32
  }
  func.func @transform_7(%arg0: i32) -> (i32, i32) {
    %c0_i32 = arith.constant 0 : i32
    %c0_i32_0 = arith.constant 0 : i32
    return %arg0, %c0_i32 : i32, i32
  }
}

</mosaic_0001>

<bundles_post_ra>
// kernel: tpu_custom_call.1
= control target key start
LH: loop header
LB: loop body
LE: loop exit
PB: predicated region body
PF: predicated region fallthrough
CT: control target
= control target key end

     0   :  { %s4110_s0 = inlined_call_operand.hbm [shape: bf16[8,896], index: 0, kind: input, shape index: {}]   ;;  %s4111_s1 = inlined_call_operand.hbm [shape: bf16[896,512], index: 1, kind: input, shape index: {}]   ;;  %s4112_s2 = inlined_call_operand.hbm [shape: f32[1,512], index: 2, kind: input, shape index: {}]   ;;  %s4113_s3 = inlined_call_operand.hbm [shape: bf16[512,256], index: 3, kind: input, shape index: {}]   ;;  %s4114_s4 = inlined_call_operand.vmem [shape: f32[1,256], index: 4, kind: input, shape index: {}]   ;;  %s4115_s5 = inlined_call_operand.vmem [shape: f32[1,256], index: 5, kind: input, shape index: {}]   ;;  %s4116_s6 = inlined_call_operand.<no memory space> [shape: f32[1,1], index: 6, kind: input, shape index: {}]   ;;  %s4117_s7 = inlined_call_operand.vmem [shape: f32[8,1], index: 7, kind: output, shape index: {}]  }
   0x1   :  { %v12_v0 = vstv %s4116_s6 }
   0x2   :  { %13 = vst [vmem:[#allocation2] sm:$0x1] %v12_v0 }
   0x3   :  { %14 = vsyncpa [#allocation4], 0 }
   0x4   :  { %15 = vsyncpa [#allocation6], 0  ;;  %s32_s28 = sshll.u32 %s4111_s1, 4  ;;  %s33_s28 = int_to_ptr.hbm [resolvable:$true] %s32_s28 }
   0x5   :  { %16 = vsyncpa [#allocation9], 0  ;;  %s3950_s29 = smov [#allocation5]   ;;  %s22_s10 = sshll.u32 %s4110_s0, 4  ;;  %s23_s10 = int_to_ptr.hbm [resolvable:$true] %s22_s10 }
   0x6   :  { %s34_s30 = sshll.u32 %s3950_s29, 4  ;;  %s3951_s11 = smov 256   ;;  %s35_s30 = int_to_ptr.vmem [resolvable:$true] %s34_s30 }
   0x7   :  { %s3952_s12 = smov 16   ;;  %s3953_s6 = smov [#allocation3]  }
   0x8   :  { %40 = dma.hbm_to_vmem [thread:$0]  %s33_s28, 28672, %s35_s30, [#allocation6], %s3951_s11, %s3951_s11, %s3952_s12  }
   0x9   :  { %s24_s13 = sshll.u32 %s3953_s6, 4  ;;  %s46_s16 = sshll.u32 %s4112_s2, 4  ;;  %s25_s13 = int_to_ptr.vmem [resolvable:$true] %s24_s13  ;;  %s47_s16 = int_to_ptr.hbm [resolvable:$true] %s46_s16 }
   0xa   :  { %27 = dma.hbm_to_vmem [thread:$0]  %s23_s10, 448, %s25_s13, [#allocation4]  }
   0xb   :  { %s56_s18 = sshll.u32 %s4113_s3, 4  ;;  %s3954_s19 = smov [#allocation7]   ;;  %s57_s18 = int_to_ptr.hbm [resolvable:$true] %s56_s18 }
   0xc   :  { %s48_s20 = sshll.u32 %s3954_s19, 4  ;;  %s3955_s0 = smov [#allocation8]   ;;  %s49_s20 = int_to_ptr.vmem [resolvable:$true] %s48_s20 }
   0xd   :  { %51 = dma.hbm_to_vmem [thread:$0]  %s47_s16, 64, %s49_s20, [#allocation6]  }
   0xe   :  { %s58_s21 = sshll.u32 %s3955_s0, 4  ;;  %s3956_s22 = smov 128   ;;  %s59_s21 = int_to_ptr.vmem [resolvable:$true] %s58_s21 }
   0xf   :  { %s3957_s23 = smov 8  }
  0x10   :  { %64 = dma.hbm_to_vmem [thread:$0]  %s57_s18, 8192, %s59_s21, [#allocation9], %s3956_s22, %s3956_s22, %s3957_s23  }
  0x11   :  { %3944 = dma.done.wait [#allocation4], 448  }
  0x12   :  { %3945 = vsyncadd [#allocation4], 4294966848 }
  0x13   :  { %3946 = dma.done.wait [#allocation6], 28736  }
  0x14   :  { %3947 = vsyncadd [#allocation6], 4294938560 }
  0x15   :  { %3948 = dma.done.wait [#allocation9], 8192  }
  0x16   :  { %3949 = vsyncadd [#allocation9], 4294959104  ;;  %v2508_v1 = vld [vmem:[#allocation5 + $0xe0] sm:$0xf]  ;;  %v3577_v2 = vld [vmem:[#allocation5 + $0xec] sm:$0xf0] }
  0x17   :  { %v2636_v3 = vld [vmem:[#allocation5 + $0x1e0] sm:$0xf]  ;;  %v2509_v4 = vor.u32 %v3577_v2, %v2508_v1  ;;  %v3609_v5 = vld [vmem:[#allocation5 + $0x1ec] sm:$0xf0]  ;;  %vm2385_vm9 = vcmask 7168  }
  0x18   :  { %v2764_v6 = vld [vmem:[#allocation5 + $0x2e0] sm:$0xf]  ;;  %v3641_v7 = vld [vmem:[#allocation5 + $0x2ec] sm:$0xf0]  ;;  %v2637_v8 = vor.u32 %v3609_v5, %v2636_v3 }
  0x19   :  { %v2765_v9 = vor.u32 %v3641_v7, %v2764_v6  ;;  %v2892_v10 = vld [vmem:[#allocation5 + $0x3e0] sm:$0xf]  ;;  %v3673_v11 = vld [vmem:[#allocation5 + $0x3ec] sm:$0xf0]  ;;  %1470 = vmatpush.bf16.msra.mxu0 %v2509_v4 }
  0x1a   :  { %v2492_v12 = vld [vmem:[#allocation5 + $0xc0] sm:$0xf]  ;;  %v2893_v13 = vor.u32 %v3673_v11, %v2892_v10  ;;  %v3573_v14 = vld [vmem:[#allocation5 + $0xcc] sm:$0xf0]  ;;  %1483 = vmatpush.bf16.msra.mxu1 %v2637_v8 }
  0x1b   :  { %v2620_v15 = vld [vmem:[#allocation5 + $0x1c0] sm:$0xf]  ;;  %v3605_v16 = vld [vmem:[#allocation5 + $0x1cc] sm:$0xf0]  ;;  %1496 = vmatpush.bf16.msra.mxu2 %v2765_v9  ;;  %v2493_v17 = vor.u32 %v3573_v14, %v2492_v12 }
  0x1c   :  { %v2621_v18 = vor.u32 %v3605_v16, %v2620_v15  ;;  %v2748_v19 = vld [vmem:[#allocation5 + $0x2c0] sm:$0xf]  ;;  %v3637_v20 = vld [vmem:[#allocation5 + $0x2cc] sm:$0xf0]  ;;  %1509 = vmatpush.bf16.msra.mxu3 %v2893_v13 }
  0x1d   :  { %v2876_v21 = vld [vmem:[#allocation5 + $0x3c0] sm:$0xf]  ;;  %v2749_v22 = vor.u32 %v3637_v20, %v2748_v19  ;;  %v3669_v23 = vld [vmem:[#allocation5 + $0x3cc] sm:$0xf0]  ;;  %1471 = vmatpush.bf16.msra.mxu0 %v2493_v17 }
  0x1e   :  { %v2476_v24 = vld [vmem:[#allocation5 + $0xa0] sm:$0xf]  ;;  %v3569_v25 = vld [vmem:[#allocation5 + $0xac] sm:$0xf0]  ;;  %v2877_v26 = vor.u32 %v3669_v23, %v2876_v21  ;;  %1484 = vmatpush.bf16.msra.mxu1 %v2621_v18 }
  0x1f   :  { %v2604_v27 = vld [vmem:[#allocation5 + $0x1a0] sm:$0xf]  ;;  %v3601_v28 = vld [vmem:[#allocation5 + $0x1ac] sm:$0xf0]  ;;  %v2477_v30 = vor.u32 %v3569_v25, %v2476_v24  ;;  %1497 = vmatpush.bf16.msra.mxu2 %v2749_v22 }
  0x20   :  { %v2732_v29 = vld [vmem:[#allocation5 + $0x2a0] sm:$0xf]  ;;  %v3633_v31 = vld [vmem:[#allocation5 + $0x2ac] sm:$0xf0]  ;;  %v2605_v34 = vor.u32 %v3601_v28, %v2604_v27  ;;  %1510 = vmatpush.bf16.msra.mxu3 %v2877_v26 }
  0x21   :  { %v2860_v32 = vld [vmem:[#allocation5 + $0x3a0] sm:$0xf]  ;;  %v3665_v33 = vld [vmem:[#allocation5 + $0x3ac] sm:$0xf0]  ;;  %v2733_v35 = vor.u32 %v3633_v31, %v2732_v29  ;;  %1472 = vmatpush.bf16.msra.mxu0 %v2477_v30 }
  0x22   :  { %v2460_v36 = vld [vmem:[#allocation5 + $0x80] sm:$0xf]  ;;  %v3565_v37 = vld [vmem:[#allocation5 + $0x8c] sm:$0xf0]  ;;  %v2861_v39 = vor.u32 %v3665_v33, %v2860_v32  ;;  %1485 = vmatpush.bf16.msra.mxu1 %v2605_v34 }
  0x23   :  { %v2588_v38 = vld [vmem:[#allocation5 + $0x180] sm:$0xf]  ;;  %v3597_v40 = vld [vmem:[#allocation5 + $0x18c] sm:$0xf0]  ;;  %v2461_v45 = vor.u32 %v3565_v37, %v2460_v36  ;;  %1498 = vmatpush.bf16.msra.mxu2 %v2733_v35 }
  0x24   :  { %v2716_v41 = vld [vmem:[#allocation5 + $0x280] sm:$0xf]  ;;  %v3629_v42 = vld [vmem:[#allocation5 + $0x28c] sm:$0xf0]  ;;  %v2589_v46 = vor.u32 %v3597_v40, %v2588_v38  ;;  %1511 = vmatpush.bf16.msra.mxu3 %v2861_v39  ;;  %v3575_v38 = vld [vmem:[#allocation5 + $0xe4] sm:$0xf] }
  0x25   :  { %v2844_v43 = vld [vmem:[#allocation5 + $0x380] sm:$0xf]  ;;  %v3661_v44 = vld [vmem:[#allocation5 + $0x38c] sm:$0xf0]  ;;  %v2717_v47 = vor.u32 %v3629_v42, %v2716_v41  ;;  %1473 = vmatpush.bf16.msra.mxu0 %v2461_v45  ;;  %v2510_v39 = vld [vmem:[#allocation5 + $0xf0] sm:$0xf0] }
  0x26   :  { %v2444_v48 = vld [vmem:[#allocation5 + $0x60] sm:$0xf]  ;;  %v3561_v49 = vld [vmem:[#allocation5 + $0x6c] sm:$0xf0]  ;;  %v2845_v51 = vor.u32 %v3661_v44, %v2844_v43  ;;  %1486 = vmatpush.bf16.msra.mxu1 %v2589_v46 }
  0x27   :  { %v2572_v50 = vld [vmem:[#allocation5 + $0x160] sm:$0xf]  ;;  %v3593_v52 = vld [vmem:[#allocation5 + $0x16c] sm:$0xf0]  ;;  %v2445_v57 = vor.u32 %v3561_v49, %v2444_v48  ;;  %1499 = vmatpush.bf16.msra.mxu2 %v2717_v47  ;;  %v2513_v47 = vor.u32 %v3575_v38, %v2510_v39 }
  0x28   :  { %v2700_v53 = vld [vmem:[#allocation5 + $0x260] sm:$0xf]  ;;  %v3625_v54 = vld [vmem:[#allocation5 + $0x26c] sm:$0xf0]  ;;  %v2573_v58 = vor.u32 %v3593_v52, %v2572_v50  ;;  %1512 = vmatpush.bf16.msra.mxu3 %v2845_v51  ;;  %v3571_v51 = vld [vmem:[#allocation5 + $0xc4] sm:$0xf] }
  0x29   :  { %v2828_v55 = vld [vmem:[#allocation5 + $0x360] sm:$0xf]  ;;  %v3657_v56 = vld [vmem:[#allocation5 + $0x36c] sm:$0xf0]  ;;  %v2701_v59 = vor.u32 %v3625_v54, %v2700_v53  ;;  %1474 = vmatpush.bf16.msra.mxu0 %v2445_v57  ;;  %v2494_v52 = vld [vmem:[#allocation5 + $0xd0] sm:$0xf0] }
  0x2a   :  { %v2428_v60 = vld [vmem:[#allocation5 + $0x40] sm:$0xf]  ;;  %v3557_v61 = vld [vmem:[#allocation5 + $0x4c] sm:$0xf0]  ;;  %v2829_v63 = vor.u32 %v3657_v56, %v2828_v55  ;;  %1487 = vmatpush.bf16.msra.mxu1 %v2573_v58 }
  0x2b   :  { %v2556_v62 = vld [vmem:[#allocation5 + $0x140] sm:$0xf]  ;;  %v3589_v0 = vld [vmem:[#allocation5 + $0x14c] sm:$0xf0]  ;;  %v2429_v5 = vor.u32 %v3557_v61, %v2428_v60  ;;  %1500 = vmatpush.bf16.msra.mxu2 %v2701_v59  ;;  %v2497_v60 = vor.u32 %v3571_v51, %v2494_v52 }
  0x2c   :  { %v2684_v1 = vld [vmem:[#allocation5 + $0x240] sm:$0xf]  ;;  %v3621_v2 = vld [vmem:[#allocation5 + $0x24c] sm:$0xf0]  ;;  %v2557_v6 = vor.u32 %v3589_v0, %v2556_v62  ;;  %1513 = vmatpush.bf16.msra.mxu3 %v2829_v63 }
  0x2d   :  { %v2812_v3 = vld [vmem:[#allocation5 + $0x340] sm:$0xf]  ;;  %v3653_v4 = vld [vmem:[#allocation5 + $0x34c] sm:$0xf0]  ;;  %v2685_v7 = vor.u32 %v3621_v2, %v2684_v1  ;;  %1475 = vmatpush.bf16.msra.mxu0 %v2429_v5  ;;  %v3567_v2 = vld [vmem:[#allocation5 + $0xa4] sm:$0xf] }
  0x2e   :  { %v2412_v8 = vld [vmem:[#allocation5 + $0x20] sm:$0xf]  ;;  %v3553_v9 = vld [vmem:[#allocation5 + $0x2c] sm:$0xf0]  ;;  %v2813_v11 = vor.u32 %v3653_v4, %v2812_v3  ;;  %1488 = vmatpush.bf16.msra.mxu1 %v2557_v6  ;;  %v2478_v3 = vld [vmem:[#allocation5 + $0xb0] sm:$0xf0] }
  0x2f   :  { %v2540_v10 = vld [vmem:[#allocation5 + $0x120] sm:$0xf]  ;;  %v3585_v12 = vld [vmem:[#allocation5 + $0x12c] sm:$0xf0]  ;;  %v2413_v17 = vor.u32 %v3553_v9, %v2412_v8  ;;  %1501 = vmatpush.bf16.msra.mxu2 %v2685_v7  ;;  %v87_v6 = vld [vmem:[#allocation3] sm:$0xff] }
  0x30   :  { %v2668_v13 = vld [vmem:[#allocation5 + $0x220] sm:$0xf]  ;;  %v3617_v14 = vld [vmem:[#allocation5 + $0x22c] sm:$0xf0]  ;;  %v2541_v20 = vor.u32 %v3585_v12, %v2540_v10  ;;  %1514 = vmatpush.bf16.msra.mxu3 %v2813_v11 }
  0x31   :  { %v2796_v15 = vld [vmem:[#allocation5 + $0x320] sm:$0xf]  ;;  %v3649_v16 = vld [vmem:[#allocation5 + $0x32c] sm:$0xf0]  ;;  %v2669_v21 = vor.u32 %v3617_v14, %v2668_v13  ;;  %1476 = vmatpush.bf16.msra.mxu0 %v2413_v17  ;;  %v329_v13 = vunpack.c.l.b16 %v87_v6  ;;  %v330_v14 = vunpack.c.h.b16 %v87_v6 }
  0x32   :  { %v2396_v18 = vld [vmem:[#allocation5] sm:$0xf]  ;;  %v3549_v19 = vld [vmem:[#allocation5 + $0xc] sm:$0xf0]  ;;  %v2797_v25 = vor.u32 %v3649_v16, %v2796_v15  ;;  %1489 = vmatpush.bf16.msra.mxu1 %v2541_v20  ;;  %v2481_v15 = vor.u32 %v3567_v2, %v2478_v3  ;;  %v2462_v20 = vld [vmem:[#allocation5 + $0x90] sm:$0xf0] }
  0x33   :  { %v2524_v22 = vld [vmem:[#allocation5 + $0x100] sm:$0xf]  ;;  %v3581_v23 = vld [vmem:[#allocation5 + $0x10c] sm:$0xf0]  ;;  %v2397_v32 = vor.u32 %v3549_v19, %v2396_v18  ;;  %1502 = vmatpush.bf16.msra.mxu2 %v2669_v21  ;;  %v3563_v19 = vld [vmem:[#allocation5 + $0x84] sm:$0xf]  ;;  %v4018_v21 = vpack.c.b16 %v329_v13, %v329_v13 }
  0x34   :  { %v2652_v24 = vld [vmem:[#allocation5 + $0x200] sm:$0xf]  ;;  %v3613_v26 = vld [vmem:[#allocation5 + $0x20c] sm:$0xf0]  ;;  %v2525_v36 = vor.u32 %v3581_v23, %v2524_v22  ;;  %1515 = vmatpush.bf16.msra.mxu3 %v2797_v25  ;;  %v4020_v22 = vpack.c.b16 %v330_v14, %v330_v14  ;;  %v3639_v13 = vld [vmem:[#allocation5 + $0x2e4] sm:$0xf] }
  0x35   :  { %v2780_v27 = vld [vmem:[#allocation5 + $0x300] sm:$0xf]  ;;  %v3645_v28 = vld [vmem:[#allocation5 + $0x30c] sm:$0xf0]  ;;  %v2653_v37 = vor.u32 %v3613_v26, %v2652_v24  ;;  %1477 = vmatpush.bf16.msra.mxu0 %v2397_v32 }
  0x36   :  { %v3020_v29 = vld [vmem:[#allocation5 + $0x4e0] sm:$0xf]  ;;  %v3705_v30 = vld [vmem:[#allocation5 + $0x4ec] sm:$0xf0]  ;;  %v2781_v40 = vor.u32 %v3645_v28, %v2780_v27  ;;  %1490 = vmatpush.bf16.msra.mxu1 %v2525_v36 }
  0x37   :  { %v3148_v31 = vld [vmem:[#allocation5 + $0x5e0] sm:$0xf]  ;;  %v3737_v33 = vld [vmem:[#allocation5 + $0x5ec] sm:$0xf0]  ;;  %v3021_v41 = vor.u32 %v3705_v30, %v3020_v29  ;;  %1503 = vmatpush.bf16.msra.mxu2 %v2653_v37  ;;  %v2465_v29 = vor.u32 %v3563_v19, %v2462_v20 }
  0x38   :  { %v3276_v34 = vld [vmem:[#allocation5 + $0x6e0] sm:$0xf]  ;;  %v3769_v35 = vld [vmem:[#allocation5 + $0x6ec] sm:$0xf0]  ;;  %v3149_v42 = vor.u32 %v3737_v33, %v3148_v31  ;;  %1516 = vmatpush.bf16.msra.mxu3 %v2781_v40  ;;  %1478 = vmatmul.bf16.vlgmr.msra.gmra.mxu0 %v4018_v21  ;;  %v3559_v33 = vld [vmem:[#allocation5 + $0x64] sm:$0xf] }
  0x39   :  { %v3277_v43 = vor.u32 %v3769_v35, %v3276_v34  ;;  %v3004_v44 = vld [vmem:[#allocation5 + $0x4c0] sm:$0xf]  ;;  %v3701_v45 = vld [vmem:[#allocation5 + $0x4cc] sm:$0xf0]  ;;  %1522 = vmatpush.bf16.msrb.mxu0 %v3021_v41  ;;  %v2446_v34 = vld [vmem:[#allocation5 + $0x70] sm:$0xf0]  ;;  %1491 = vmatmul.bf16.vlgmr.msra.gmra.mxu1 %v4020_v22 }
  0x3a   :  { %v3132_v46 = vld [vmem:[#allocation5 + $0x5c0] sm:$0xf]  ;;  %v3733_v48 = vld [vmem:[#allocation5 + $0x5cc] sm:$0xf0]  ;;  %v3005_v53 = vor.u32 %v3701_v45, %v3004_v44  ;;  %1535 = vmatpush.bf16.msrb.mxu1 %v3149_v42  ;;  %v2449_v41 = vor.u32 %v3559_v33, %v2446_v34  ;;  %v3555_v45 = vld [vmem:[#allocation5 + $0x44] sm:$0xf] }
  0x3b   :  { %v3260_v49 = vld [vmem:[#allocation5 + $0x6c0] sm:$0xf]  ;;  %v3765_v50 = vld [vmem:[#allocation5 + $0x6cc] sm:$0xf0]  ;;  %1548 = vmatpush.bf16.msrb.mxu2 %v3277_v43  ;;  %v3133_v55 = vor.u32 %v3733_v48, %v3132_v46  ;;  %v2430_v46 = vld [vmem:[#allocation5 + $0x50] sm:$0xf0] }
  0x3c   :  { %v2988_v54 = vld [vmem:[#allocation5 + $0x4a0] sm:$0xf]  ;;  %v3261_v56 = vor.u32 %v3765_v50, %v3260_v49  ;;  %v3697_v57 = vld [vmem:[#allocation5 + $0x4ac] sm:$0xf0]  ;;  %1561 = vmatpush.bf16.msrb.mxu3 %v2513_v47  ;;  %v3635_v33 = vld [vmem:[#allocation5 + $0x2c4] sm:$0xf] }
  0x3d   :  { %v3116_v58 = vld [vmem:[#allocation5 + $0x5a0] sm:$0xf]  ;;  %v88_v59 = vld [vmem:[#allocation3 + $0x8] sm:$0xff]  ;;  %1523 = vmatpush.bf16.msrb.mxu0 %v3005_v53  ;;  %v2989_v4 = vor.u32 %v3697_v57, %v2988_v54  ;;  %v2433_v53 = vor.u32 %v3555_v45, %v2430_v46  ;;  %v3551_v57 = vld [vmem:[#allocation5 + $0x24] sm:$0xf] }
  0x3e   :  { %v3729_v61 = vld [vmem:[#allocation5 + $0x5ac] sm:$0xf0]  ;;  %v3244_v62 = vld [vmem:[#allocation5 + $0x6a0] sm:$0xf]  ;;  %v331_v0 = vunpack.c.l.b16 %v88_v59  ;;  %v332_v1 = vunpack.c.h.b16 %v88_v59  ;;  %1536 = vmatpush.bf16.msrb.mxu1 %v3133_v55  ;;  %v3599_v46 = vld [vmem:[#allocation5 + $0x1a4] sm:$0xf] }
  0x3f   :  { %v3761_v63 = vld [vmem:[#allocation5 + $0x6ac] sm:$0xf0]  ;;  %1549 = vmatpush.bf16.msrb.mxu2 %v3261_v56  ;;  %v3117_v8 = vor.u32 %v3729_v61, %v3116_v58  ;;  %v2972_v10 = vld [vmem:[#allocation5 + $0x480] sm:$0xf]  ;;  %v2414_v58 = vld [vmem:[#allocation5 + $0x30] sm:$0xf0] }
  0x40   :  { %v4013_v5 = vpack.c.b16 %v331_v0, %v331_v0  ;;  %v4015_v7 = vpack.c.b16 %v332_v1, %v332_v1  ;;  %v3245_v9 = vor.u32 %v3761_v63, %v3244_v62  ;;  %v3693_v11 = vld [vmem:[#allocation5 + $0x48c] sm:$0xf0]  ;;  %v3100_v12 = vld [vmem:[#allocation5 + $0x580] sm:$0xf]  ;;  %1562 = vmatpush.bf16.msrb.mxu3 %v2497_v60  ;;  %v2417_v6 = vor.u32 %v3551_v57, %v2414_v58  ;;  %v3595_v58 = vld [vmem:[#allocation5 + $0x184] sm:$0xf] }
  0x41   :  { %v3725_v16 = vld [vmem:[#allocation5 + $0x58c] sm:$0xf0]  ;;  %v3228_v17 = vld [vmem:[#allocation5 + $0x680] sm:$0xf]  ;;  %1524 = vmatpush.bf16.msrb.mxu0 %v2989_v4  ;;  %v2973_v23 = vor.u32 %v3693_v11, %v2972_v10  ;;  %v90_v4 = vld [vmem:[#allocation3 + $0x18] sm:$0xf] }
  0x42   :  { %v3757_v18 = vld [vmem:[#allocation5 + $0x68c] sm:$0xf0]  ;;  %1504 = vmatmul.bf16.vlgmr.msra.gmra.mxu2 %v4013_v5  ;;  %1517 = vmatmul.bf16.vlgmr.msra.gmra.mxu3 %v4015_v7  ;;  %v3101_v24 = vor.u32 %v3725_v16, %v3100_v12  ;;  %v2956_v26 = vld [vmem:[#allocation5 + $0x460] sm:$0xf]  ;;  %v89_v10 = vld [vmem:[#allocation3 + $0x10] sm:$0xff] }
  0x43   :  { %1537 = vmatpush.bf16.msrb.mxu1 %v3117_v8  ;;  %1550 = vmatpush.bf16.msrb.mxu2 %v3245_v9  ;;  %v3229_v25 = vor.u32 %v3757_v18, %v3228_v17  ;;  %v3689_v27 = vld [vmem:[#allocation5 + $0x46c] sm:$0xf0]  ;;  %v3084_v28 = vld [vmem:[#allocation5 + $0x560] sm:$0xf]  ;;  %v3547_v8 = vld [vmem:[#allocation5 + $0x4] sm:$0xf]  ;;  %v335_v18 = vunpack.c.l.b16 %v90_v4 }
  0x44   :  { %1563 = vmatpush.bf16.msrb.mxu3 %v2481_v15  ;;  %v3721_v30 = vld [vmem:[#allocation5 + $0x56c] sm:$0xf0]  ;;  %v3212_v31 = vld [vmem:[#allocation5 + $0x660] sm:$0xf]  ;;  %v2957_v35 = vor.u32 %v3689_v27, %v2956_v26  ;;  %v2398_v9 = vld [vmem:[#allocation5 + $0x10] sm:$0xf0]  ;;  %v334_v26 = vunpack.c.h.b16 %v89_v10 }
  0x45   :  { %v3753_v32 = vld [vmem:[#allocation5 + $0x66c] sm:$0xf0]  ;;  %1525 = vmatpush.bf16.msrb.mxu0 %v2973_v23  ;;  %v3085_v36 = vor.u32 %v3721_v30, %v3084_v28  ;;  %v2940_v38 = vld [vmem:[#allocation5 + $0x440] sm:$0xf]  ;;  %v3607_v11 = vld [vmem:[#allocation5 + $0x1e4] sm:$0xf]  ;;  %v2401_v27 = vor.u32 %v3547_v8, %v2398_v9 }
  0x46   :  { %v3213_v37 = vor.u32 %v3753_v32, %v3212_v31  ;;  %v3685_v39 = vld [vmem:[#allocation5 + $0x44c] sm:$0xf0]  ;;  %v3068_v40 = vld [vmem:[#allocation5 + $0x540] sm:$0xf]  ;;  %v2638_v12 = vld [vmem:[#allocation5 + $0x1f0] sm:$0xf0] }
  0x47   :  { %1538 = vmatpush.bf16.msrb.mxu1 %v3101_v24  ;;  %1551 = vmatpush.bf16.msrb.mxu2 %v3229_v25  ;;  %v3717_v42 = vld [vmem:[#allocation5 + $0x54c] sm:$0xf0]  ;;  %v3196_v43 = vld [vmem:[#allocation5 + $0x640] sm:$0xf]  ;;  %v2941_v47 = vor.u32 %v3685_v39, %v2940_v38  ;;  %v2766_v15 = vld [vmem:[#allocation5 + $0x2f0] sm:$0xf0]  ;;  %v333_v25 = vunpack.c.l.b16 %v89_v10  ;;  %v2641_v28 = vor.u32 %v3607_v11, %v2638_v12  ;;  %v4025_v38 = vpack.c.b16 %v335_v18, %v335_v18 }
  0x48   :  { %1564 = vmatpush.bf16.msrb.mxu3 %v2465_v29  ;;  %v3749_v44 = vld [vmem:[#allocation5 + $0x64c] sm:$0xf0]  ;;  %v3069_v48 = vor.u32 %v3717_v42, %v3068_v40  ;;  %v2924_v50 = vld [vmem:[#allocation5 + $0x420] sm:$0xf]  ;;  %v3671_v16 = vld [vmem:[#allocation5 + $0x3e4] sm:$0xf]  ;;  %v2769_v29 = vor.u32 %v3639_v13, %v2766_v15  ;;  %v4029_v42 = vpack.c.b16 %v334_v26, %v334_v26 }
  0x49   :  { %1526 = vmatpush.bf16.msrb.mxu0 %v2957_v35  ;;  %v3197_v49 = vor.u32 %v3749_v44, %v3196_v43  ;;  %v3681_v51 = vld [vmem:[#allocation5 + $0x42c] sm:$0xf0]  ;;  %v3052_v52 = vld [vmem:[#allocation5 + $0x520] sm:$0xf]  ;;  %v2894_v17 = vld [vmem:[#allocation5 + $0x3f0] sm:$0xf0] }
  0x4a   :  { %v3713_v54 = vld [vmem:[#allocation5 + $0x52c] sm:$0xf0]  ;;  %v3180_v55 = vld [vmem:[#allocation5 + $0x620] sm:$0xf]  ;;  %v2925_v60 = vor.u32 %v3681_v51, %v2924_v50  ;;  %v3703_v23 = vld [vmem:[#allocation5 + $0x4e4] sm:$0xf]  ;;  %v2897_v30 = vor.u32 %v3671_v16, %v2894_v17 }
  0x4b   :  { %1539 = vmatpush.bf16.msrb.mxu1 %v3085_v36  ;;  %1552 = vmatpush.bf16.msrb.mxu2 %v3213_v37  ;;  %v3745_v56 = vld [vmem:[#allocation5 + $0x62c] sm:$0xf0]  ;;  %v2908_v59 = vld [vmem:[#allocation5 + $0x400] sm:$0xf]  ;;  %v3053_v0 = vor.u32 %v3713_v54, %v3052_v52  ;;  %v3022_v24 = vld [vmem:[#allocation5 + $0x4f0] sm:$0xf0] }
  0x4c   :  { %1565 = vmatpush.bf16.msrb.mxu3 %v2449_v41  ;;  %v3677_v61 = vld [vmem:[#allocation5 + $0x40c] sm:$0xf0]  ;;  %v3036_v62 = vld [vmem:[#allocation5 + $0x500] sm:$0xf]  ;;  %v3181_v1 = vor.u32 %v3745_v56, %v3180_v55  ;;  %v3603_v31 = vld [vmem:[#allocation5 + $0x1c4] sm:$0xf]  ;;  %v3025_v34 = vor.u32 %v3703_v23, %v3022_v24  ;;  %v4027_v41 = vpack.c.b16 %v333_v25, %v333_v25 }
  0x4d   :  { %1527 = vmatpush.bf16.msrb.mxu0 %v2941_v47  ;;  %v3709_v63 = vld [vmem:[#allocation5 + $0x50c] sm:$0xf0]  ;;  %v3164_v2 = vld [vmem:[#allocation5 + $0x600] sm:$0xf]  ;;  %v2909_v14 = vor.u32 %v3677_v61, %v2908_v59  ;;  %v2622_v32 = vld [vmem:[#allocation5 + $0x1d0] sm:$0xf0] }
  0x4e   :  { %v3741_v3 = vld [vmem:[#allocation5 + $0x60c] sm:$0xf0]  ;;  %v3037_v19 = vor.u32 %v3709_v63, %v3036_v62  ;;  %v2750_v35 = vld [vmem:[#allocation5 + $0x2d0] sm:$0xf0]  ;;  %v3667_v36 = vld [vmem:[#allocation5 + $0x3c4] sm:$0xf]  ;;  %v2625_v43 = vor.u32 %v3603_v31, %v2622_v32 }
  0x4f   :  { %1540 = vmatpush.bf16.msrb.mxu1 %v3069_v48  ;;  %1553 = vmatpush.bf16.msrb.mxu2 %v3197_v49  ;;  %v3165_v20 = vor.u32 %v3741_v3, %v3164_v2  ;;  %v2878_v37 = vld [vmem:[#allocation5 + $0x3d0] sm:$0xf0]  ;;  %v3699_v39 = vld [vmem:[#allocation5 + $0x4c4] sm:$0xf]  ;;  %v2753_v44 = vor.u32 %v3635_v33, %v2750_v35 }
  0x50   :  { %1566 = vmatpush.bf16.msrb.mxu3 %v2433_v53  ;;  %v3006_v40 = vld [vmem:[#allocation5 + $0x4d0] sm:$0xf0]  ;;  %v2881_v45 = vor.u32 %v3667_v36, %v2878_v37  ;;  %v3631_v48 = vld [vmem:[#allocation5 + $0x2a4] sm:$0xf] }
  0x51   :  { %1528 = vmatpush.bf16.msrb.mxu0 %v2925_v60  ;;  %v2606_v47 = vld [vmem:[#allocation5 + $0x1b0] sm:$0xf0]  ;;  %v3009_v49 = vor.u32 %v3699_v39, %v3006_v40  ;;  %v3663_v51 = vld [vmem:[#allocation5 + $0x3a4] sm:$0xf] }
  0x52   :  { %v2734_v50 = vld [vmem:[#allocation5 + $0x2b0] sm:$0xf0]  ;;  %v3695_v53 = vld [vmem:[#allocation5 + $0x4a4] sm:$0xf]  ;;  %v2609_v55 = vor.u32 %v3599_v46, %v2606_v47 }
  0x53   :  { %1541 = vmatpush.bf16.msrb.mxu1 %v3053_v0  ;;  %1554 = vmatpush.bf16.msrb.mxu2 %v3181_v1  ;;  %v2862_v52 = vld [vmem:[#allocation5 + $0x3b0] sm:$0xf0]  ;;  %v2737_v56 = vor.u32 %v3631_v48, %v2734_v50  ;;  %v3627_v60 = vld [vmem:[#allocation5 + $0x284] sm:$0xf] }
  0x54   :  { %1567 = vmatpush.bf16.msrb.mxu3 %v2417_v6  ;;  %v2990_v54 = vld [vmem:[#allocation5 + $0x4b0] sm:$0xf0]  ;;  %v2865_v57 = vor.u32 %v3663_v51, %v2862_v52  ;;  %v3659_v63 = vld [vmem:[#allocation5 + $0x384] sm:$0xf] }
  0x55   :  { %1529 = vmatpush.bf16.msrb.mxu0 %v2909_v14  ;;  %v2590_v59 = vld [vmem:[#allocation5 + $0x190] sm:$0xf0]  ;;  %v2993_v61 = vor.u32 %v3695_v53, %v2990_v54  ;;  %v3691_v1 = vld [vmem:[#allocation5 + $0x484] sm:$0xf] }
  0x56   :  { %v2718_v62 = vld [vmem:[#allocation5 + $0x290] sm:$0xf0]  ;;  %v2593_v3 = vor.u32 %v3595_v58, %v2590_v59  ;;  %v3591_v8 = vld [vmem:[#allocation5 + $0x164] sm:$0xf] }
  0x57   :  { %1542 = vmatpush.bf16.msrb.mxu1 %v3037_v19  ;;  %1555 = vmatpush.bf16.msrb.mxu2 %v3165_v20  ;;  %v2846_v0 = vld [vmem:[#allocation5 + $0x390] sm:$0xf0]  ;;  %v2721_v4 = vor.u32 %v3627_v60, %v2718_v62  ;;  %v3623_v10 = vld [vmem:[#allocation5 + $0x264] sm:$0xf] }
  0x58   :  { %1568 = vmatpush.bf16.msrb.mxu3 %v2401_v27  ;;  %1530 = vmatmul.bf16.vlgmr.msrb.gmra.mxu0 %v4027_v41  ;;  %v2974_v2 = vld [vmem:[#allocation5 + $0x490] sm:$0xf0]  ;;  %v2849_v6 = vor.u32 %v3659_v63, %v2846_v0  ;;  %v3655_v13 = vld [vmem:[#allocation5 + $0x364] sm:$0xf]  ;;  %v2516_v63 = vld [vmem:[#allocation5 + $0xe8] sm:$0xf] }
  0x59   :  { %1574 = vmatpush.bf16.msra.mxu0 %v2641_v28  ;;  %v2574_v9 = vld [vmem:[#allocation5 + $0x170] sm:$0xf0]  ;;  %v2977_v11 = vor.u32 %v3691_v1, %v2974_v2  ;;  %v3687_v15 = vld [vmem:[#allocation5 + $0x464] sm:$0xf]  ;;  %v3578_v0 = vld [vmem:[#allocation5 + $0xf4] sm:$0xf0] }
  0x5a   :  { %1556 = vmatmul.bf16.vlgmr.msrb.gmra.mxu2 %v4025_v38  ;;  %1543 = vmatmul.bf16.vlgmr.msrb.gmra.mxu1 %v4029_v42  ;;  %v2702_v12 = vld [vmem:[#allocation5 + $0x270] sm:$0xf0]  ;;  %v2577_v17 = vor.u32 %v3591_v8, %v2574_v9  ;;  %v3587_v20 = vld [vmem:[#allocation5 + $0x144] sm:$0xf] }
  0x5b   :  { %1587 = vmatpush.bf16.msra.mxu1 %v2769_v29  ;;  %1600 = vmatpush.bf16.msra.mxu2 %v2897_v30  ;;  %v2830_v14 = vld [vmem:[#allocation5 + $0x370] sm:$0xf0]  ;;  %v2705_v18 = vor.u32 %v3623_v10, %v2702_v12  ;;  %v3619_v24 = vld [vmem:[#allocation5 + $0x244] sm:$0xf]  ;;  %v2517_v10 = vor.u32 %v3578_v0, %v2516_v63 }
  0x5c   :  { %1613 = vmatpush.bf16.msra.mxu3 %v3025_v34  ;;  %v2958_v16 = vld [vmem:[#allocation5 + $0x470] sm:$0xf0]  ;;  %v2833_v19 = vor.u32 %v3655_v13, %v2830_v14  ;;  %v3651_v27 = vld [vmem:[#allocation5 + $0x344] sm:$0xf] }
  0x5d   :  { %1575 = vmatpush.bf16.msra.mxu0 %v2625_v43  ;;  %1569 = vmatmul.bf16.vlgmr.msrb.gmra.mxu3 %v4018_v21  ;;  %v2558_v23 = vld [vmem:[#allocation5 + $0x150] sm:$0xf0]  ;;  %v2961_v25 = vor.u32 %v3687_v15, %v2958_v16  ;;  %v3683_v29 = vld [vmem:[#allocation5 + $0x444] sm:$0xf]  ;;  %v2500_v16 = vld [vmem:[#allocation5 + $0xc8] sm:$0xf] }
  0x5e   :  { %v2686_v26 = vld [vmem:[#allocation5 + $0x250] sm:$0xf0]  ;;  %v2561_v31 = vor.u32 %v3587_v20, %v2558_v23  ;;  %v3583_v34 = vld [vmem:[#allocation5 + $0x124] sm:$0xf] }
  0x5f   :  { %1588 = vmatpush.bf16.msra.mxu1 %v2753_v44  ;;  %1601 = vmatpush.bf16.msra.mxu2 %v2881_v45  ;;  %v2814_v28 = vld [vmem:[#allocation5 + $0x350] sm:$0xf0]  ;;  %v2689_v32 = vor.u32 %v3619_v24, %v2686_v26  ;;  %v3615_v36 = vld [vmem:[#allocation5 + $0x224] sm:$0xf] }
  0x60   :  { %1614 = vmatpush.bf16.msra.mxu3 %v3009_v49  ;;  %v2942_v30 = vld [vmem:[#allocation5 + $0x450] sm:$0xf0]  ;;  %v2817_v33 = vor.u32 %v3651_v27, %v2814_v28  ;;  %v3647_v40 = vld [vmem:[#allocation5 + $0x324] sm:$0xf] }
  0x61   :  { %1576 = vmatpush.bf16.msra.mxu0 %v2609_v55  ;;  %v2542_v35 = vld [vmem:[#allocation5 + $0x130] sm:$0xf0]  ;;  %v2945_v37 = vor.u32 %v3683_v29, %v2942_v30  ;;  %v3679_v44 = vld [vmem:[#allocation5 + $0x424] sm:$0xf]  ;;  %v2484_v30 = vld [vmem:[#allocation5 + $0xa8] sm:$0xf] }
  0x62   :  { %v2670_v39 = vld [vmem:[#allocation5 + $0x230] sm:$0xf0]  ;;  %v2545_v46 = vor.u32 %v3583_v34, %v2542_v35  ;;  %v3579_v47 = vld [vmem:[#allocation5 + $0x104] sm:$0xf] }
  0x63   :  { %1589 = vmatpush.bf16.msra.mxu1 %v2737_v56  ;;  %1602 = vmatpush.bf16.msra.mxu2 %v2865_v57  ;;  %v2798_v43 = vld [vmem:[#allocation5 + $0x330] sm:$0xf0]  ;;  %v2673_v49 = vor.u32 %v3615_v36, %v2670_v39  ;;  %v3611_v51 = vld [vmem:[#allocation5 + $0x204] sm:$0xf] }
  0x64   :  { %1615 = vmatpush.bf16.msra.mxu3 %v2993_v61  ;;  %v2926_v45 = vld [vmem:[#allocation5 + $0x430] sm:$0xf0]  ;;  %v2801_v50 = vor.u32 %v3647_v40, %v2798_v43  ;;  %v3643_v53 = vld [vmem:[#allocation5 + $0x304] sm:$0xf] }
  0x65   :  { %1577 = vmatpush.bf16.msra.mxu0 %v2593_v3  ;;  %v2526_v48 = vld [vmem:[#allocation5 + $0x110] sm:$0xf0]  ;;  %v2929_v54 = vor.u32 %v3679_v44, %v2926_v45  ;;  %v3675_v56 = vld [vmem:[#allocation5 + $0x404] sm:$0xf]  ;;  %v2644_v3 = vld [vmem:[#allocation5 + $0x1e8] sm:$0xf] }
  0x66   :  { %v2654_v52 = vld [vmem:[#allocation5 + $0x210] sm:$0xf0]  ;;  %v3735_v58 = vld [vmem:[#allocation5 + $0x5e4] sm:$0xf]  ;;  %v2529_v61 = vor.u32 %v3579_v47, %v2526_v48  ;;  %v2468_v45 = vld [vmem:[#allocation5 + $0x88] sm:$0xf] }
  0x67   :  { %1590 = vmatpush.bf16.msra.mxu1 %v2721_v4  ;;  %1603 = vmatpush.bf16.msra.mxu2 %v2849_v6  ;;  %v2782_v55 = vld [vmem:[#allocation5 + $0x310] sm:$0xf0]  ;;  %v3767_v60 = vld [vmem:[#allocation5 + $0x6e4] sm:$0xf]  ;;  %v2657_v1 = vor.u32 %v3611_v51, %v2654_v52  ;;  %v3610_v4 = vld [vmem:[#allocation5 + $0x1f4] sm:$0xf0] }
  0x68   :  { %1616 = vmatpush.bf16.msra.mxu3 %v2977_v11  ;;  %v2910_v57 = vld [vmem:[#allocation5 + $0x410] sm:$0xf0]  ;;  %v2785_v2 = vor.u32 %v3643_v53, %v2782_v55  ;;  %v3731_v11 = vld [vmem:[#allocation5 + $0x5c4] sm:$0xf]  ;;  %v2645_v14 = vor.u32 %v3610_v4, %v2644_v3  ;;  %v2596_v47 = vld [vmem:[#allocation5 + $0x188] sm:$0xf] }
  0x69   :  { %1578 = vmatpush.bf16.msra.mxu0 %v2577_v17  ;;  %v3150_v59 = vld [vmem:[#allocation5 + $0x5f0] sm:$0xf0]  ;;  %v2913_v6 = vor.u32 %v3675_v56, %v2910_v57  ;;  %v3763_v13 = vld [vmem:[#allocation5 + $0x6c4] sm:$0xf]  ;;  %v3574_v17 = vld [vmem:[#allocation5 + $0xd4] sm:$0xf0] }
  0x6a   :  { %v3278_v62 = vld [vmem:[#allocation5 + $0x6f0] sm:$0xf0]  ;;  %v3153_v8 = vor.u32 %v3735_v58, %v3150_v59  ;;  %v2501_v24 = vor.u32 %v3574_v17, %v2500_v16  ;;  %v3759_v27 = vld [vmem:[#allocation5 + $0x6a4] sm:$0xf]  ;;  %v3598_v48 = vld [vmem:[#allocation5 + $0x194] sm:$0xf0] }
  0x6b   :  { %1591 = vmatpush.bf16.msra.mxu1 %v2705_v18  ;;  %1604 = vmatpush.bf16.msra.mxu2 %v2833_v19  ;;  %v3281_v9 = vor.u32 %v3767_v60, %v3278_v62  ;;  %v3134_v12 = vld [vmem:[#allocation5 + $0x5d0] sm:$0xf0]  ;;  %v2628_v18 = vld [vmem:[#allocation5 + $0x1c8] sm:$0xf]  ;;  %v3606_v19 = vld [vmem:[#allocation5 + $0x1d4] sm:$0xf0]  ;;  %v2597_v55 = vor.u32 %v3598_v48, %v2596_v47 }
  0x6c   :  { %1617 = vmatpush.bf16.msra.mxu3 %v2961_v25  ;;  %v3262_v15 = vld [vmem:[#allocation5 + $0x6d0] sm:$0xf0]  ;;  %v3137_v20 = vor.u32 %v3731_v11, %v3134_v12  ;;  %v3727_v25 = vld [vmem:[#allocation5 + $0x5a4] sm:$0xf]  ;;  %v2629_v28 = vor.u32 %v3606_v19, %v2628_v18  ;;  %v2452_v57 = vld [vmem:[#allocation5 + $0x68] sm:$0xf] }
  0x6d   :  { %1579 = vmatpush.bf16.msra.mxu0 %v2561_v31  ;;  %v3265_v23 = vor.u32 %v3763_v13, %v3262_v15  ;;  %v3118_v26 = vld [vmem:[#allocation5 + $0x5b0] sm:$0xf0]  ;;  %v3570_v31 = vld [vmem:[#allocation5 + $0xb4] sm:$0xf0]  ;;  %v3755_v40 = vld [vmem:[#allocation5 + $0x684] sm:$0xf] }
  0x6e   :  { %v3246_v29 = vld [vmem:[#allocation5 + $0x6b0] sm:$0xf0]  ;;  %v3121_v34 = vor.u32 %v3727_v25, %v3118_v26  ;;  %v2485_v36 = vor.u32 %v3570_v31, %v2484_v30  ;;  %v3719_v52 = vld [vmem:[#allocation5 + $0x564] sm:$0xf]  ;;  %v3562_v58 = vld [vmem:[#allocation5 + $0x74] sm:$0xf0] }
  0x6f   :  { %1592 = vmatpush.bf16.msra.mxu1 %v2689_v32  ;;  %1605 = vmatpush.bf16.msra.mxu2 %v2817_v33  ;;  %v2612_v32 = vld [vmem:[#allocation5 + $0x1a8] sm:$0xf]  ;;  %v3602_v33 = vld [vmem:[#allocation5 + $0x1b4] sm:$0xf0]  ;;  %v3249_v35 = vor.u32 %v3759_v27, %v3246_v29  ;;  %v3102_v39 = vld [vmem:[#allocation5 + $0x590] sm:$0xf0]  ;;  %v2453_v63 = vor.u32 %v3562_v58, %v2452_v57 }
  0x70   :  { %1618 = vmatpush.bf16.msra.mxu3 %v2945_v37  ;;  %v3723_v37 = vld [vmem:[#allocation5 + $0x584] sm:$0xf]  ;;  %v2613_v43 = vor.u32 %v3602_v33, %v2612_v32  ;;  %v3230_v44 = vld [vmem:[#allocation5 + $0x690] sm:$0xf0]  ;;  %v2580_v59 = vld [vmem:[#allocation5 + $0x168] sm:$0xf] }
  0x71   :  { %1580 = vmatpush.bf16.msra.mxu0 %v2545_v46  ;;  %v3566_v46 = vld [vmem:[#allocation5 + $0x94] sm:$0xf0]  ;;  %v3086_v53 = vld [vmem:[#allocation5 + $0x570] sm:$0xf0]  ;;  %v3715_v0 = vld [vmem:[#allocation5 + $0x544] sm:$0xf] }
  0x72   :  { %v2469_v51 = vor.u32 %v3566_v46, %v2468_v45  ;;  %v3214_v56 = vld [vmem:[#allocation5 + $0x670] sm:$0xf0]  ;;  %v3594_v60 = vld [vmem:[#allocation5 + $0x174] sm:$0xf0]  ;;  %v3743_v16 = vld [vmem:[#allocation5 + $0x624] sm:$0xf] }
  0x73   :  { %1593 = vmatpush.bf16.msra.mxu1 %v2673_v49  ;;  %1606 = vmatpush.bf16.msra.mxu2 %v2801_v50  ;;  %v3105_v49 = vor.u32 %v3723_v37, %v3102_v39  ;;  %v3233_v50 = vor.u32 %v3755_v40, %v3230_v44  ;;  %v2581_v3 = vor.u32 %v3594_v60, %v2580_v59  ;;  %v3198_v4 = vld [vmem:[#allocation5 + $0x650] sm:$0xf0]  ;;  %v2420_v19 = vld [vmem:[#allocation5 + $0x28] sm:$0xf]  ;;  %v3707_v26 = vld [vmem:[#allocation5 + $0x504] sm:$0xf] }
  0x74   :  { %1619 = vmatpush.bf16.msra.mxu3 %v2929_v54  ;;  %v3751_v54 = vld [vmem:[#allocation5 + $0x664] sm:$0xf]  ;;  %v3054_v15 = vld [vmem:[#allocation5 + $0x530] sm:$0xf0]  ;;  %v2404_v32 = vld [vmem:[#allocation5 + $0x8] sm:$0xf] }
  0x75   :  { %1581 = vmatpush.bf16.msra.mxu0 %v2529_v61  ;;  %v3089_v61 = vor.u32 %v3719_v52, %v3086_v53  ;;  %v3217_v62 = vor.u32 %v3751_v54, %v3214_v56  ;;  %v3182_v18 = vld [vmem:[#allocation5 + $0x630] sm:$0xf0]  ;;  %v3739_v30 = vld [vmem:[#allocation5 + $0x604] sm:$0xf]  ;;  %v2772_v37 = vld [vmem:[#allocation5 + $0x2e8] sm:$0xf] }
  0x76   :  { %v3038_v27 = vld [vmem:[#allocation5 + $0x510] sm:$0xf0]  ;;  %v3642_v39 = vld [vmem:[#allocation5 + $0x2f4] sm:$0xf0]  ;;  %v2900_v40 = vld [vmem:[#allocation5 + $0x3e8] sm:$0xf] }
  0x77   :  { %1594 = vmatpush.bf16.msra.mxu1 %v2657_v1  ;;  %1607 = vmatpush.bf16.msra.mxu2 %v2785_v2  ;;  %v3070_v1 = vld [vmem:[#allocation5 + $0x550] sm:$0xf0]  ;;  %v3747_v2 = vld [vmem:[#allocation5 + $0x644] sm:$0xf]  ;;  %v3674_v44 = vld [vmem:[#allocation5 + $0x3f4] sm:$0xf0]  ;;  %v2773_v52 = vor.u32 %v3642_v39, %v2772_v37 }
  0x78   :  { %1620 = vmatpush.bf16.msra.mxu3 %v2913_v6  ;;  %1582 = vmatmul.bf16.vlgmr.msra.gmra.mxu0 %v4020_v22  ;;  %v2436_v6 = vld [vmem:[#allocation5 + $0x48] sm:$0xf]  ;;  %v3073_v11 = vor.u32 %v3715_v0, %v3070_v1  ;;  %v3201_v12 = vor.u32 %v3747_v2, %v3198_v4  ;;  %v3166_v31 = vld [vmem:[#allocation5 + $0x610] sm:$0xf0]  ;;  %v3706_v46 = vld [vmem:[#allocation5 + $0x4f4] sm:$0xf0]  ;;  %v2901_v53 = vor.u32 %v3674_v44, %v2900_v40 }
  0x79   :  { %1626 = vmatpush.bf16.msrb.mxu0 %v3153_v8  ;;  %v3558_v8 = vld [vmem:[#allocation5 + $0x54] sm:$0xf0]  ;;  %v3028_v45 = vld [vmem:[#allocation5 + $0x4e8] sm:$0xf]  ;;  %v3169_v47 = vor.u32 %v3739_v30, %v3166_v31 }
  0x7a   :  { %1608 = vmatmul.bf16.vlgmr.msra.gmra.mxu2 %v4015_v7  ;;  %1595 = vmatmul.bf16.vlgmr.msra.gmra.mxu1 %v4013_v5  ;;  %v2437_v13 = vor.u32 %v3558_v8, %v2436_v6  ;;  %v3029_v54 = vor.u32 %v3706_v46, %v3028_v45  ;;  %v3638_v56 = vld [vmem:[#allocation5 + $0x2d4] sm:$0xf0]  ;;  %v2884_v57 = vld [vmem:[#allocation5 + $0x3c8] sm:$0xf] }
  0x7b   :  { %1639 = vmatpush.bf16.msrb.mxu1 %v3281_v9  ;;  %1652 = vmatpush.bf16.msrb.mxu2 %v2517_v10  ;;  %v2564_v9 = vld [vmem:[#allocation5 + $0x148] sm:$0xf]  ;;  %v3590_v10 = vld [vmem:[#allocation5 + $0x154] sm:$0xf0] }
  0x7c   :  { %1665 = vmatpush.bf16.msrb.mxu3 %v2645_v14  ;;  %v3711_v14 = vld [vmem:[#allocation5 + $0x524] sm:$0xf]  ;;  %v2565_v17 = vor.u32 %v3590_v10, %v2564_v9  ;;  %v3670_v59 = vld [vmem:[#allocation5 + $0x3d4] sm:$0xf0]  ;;  %v3012_v60 = vld [vmem:[#allocation5 + $0x4c8] sm:$0xf] }
  0x7d   :  { %1621 = vmatmul.bf16.vlgmr.msra.gmra.mxu3 %v4027_v41  ;;  %1627 = vmatpush.bf16.msrb.mxu0 %v3137_v20  ;;  %v3554_v20 = vld [vmem:[#allocation5 + $0x34] sm:$0xf0]  ;;  %v3057_v25 = vor.u32 %v3711_v14, %v3054_v15  ;;  %v2885_v1 = vor.u32 %v3670_v59, %v2884_v57  ;;  %v2868_v6 = vld [vmem:[#allocation5 + $0x3a8] sm:$0xf] }
  0x7e   :  { %v2421_v29 = vor.u32 %v3554_v20, %v2420_v19  ;;  %v3634_v4 = vld [vmem:[#allocation5 + $0x2b4] sm:$0xf0]  ;;  %v2996_v10 = vld [vmem:[#allocation5 + $0x4a8] sm:$0xf] }
  0x7f   :  { %1640 = vmatpush.bf16.msrb.mxu1 %v3265_v23  ;;  %1653 = vmatpush.bf16.msrb.mxu2 %v2501_v24  ;;  %v2548_v23 = vld [vmem:[#allocation5 + $0x128] sm:$0xf]  ;;  %v3586_v24 = vld [vmem:[#allocation5 + $0x134] sm:$0xf0] }
  0x80   :  { %1666 = vmatpush.bf16.msrb.mxu3 %v2629_v28  ;;  %v3185_v28 = vor.u32 %v3743_v16, %v3182_v18  ;;  %v2549_v33 = vor.u32 %v3586_v24, %v2548_v23  ;;  %v3666_v9 = vld [vmem:[#allocation5 + $0x3b4] sm:$0xf0]  ;;  %v2852_v19 = vld [vmem:[#allocation5 + $0x388] sm:$0xf] }
  0x81   :  { %1628 = vmatpush.bf16.msrb.mxu0 %v3121_v34  ;;  %v3550_v34 = vld [vmem:[#allocation5 + $0x14] sm:$0xf0]  ;;  %v2869_v15 = vor.u32 %v3666_v9, %v2868_v6  ;;  %v2980_v24 = vld [vmem:[#allocation5 + $0x488] sm:$0xf] }
  0x82   :  { %v2405_v48 = vor.u32 %v3550_v34, %v2404_v32  ;;  %v3630_v18 = vld [vmem:[#allocation5 + $0x294] sm:$0xf0]  ;;  %v2708_v31 = vld [vmem:[#allocation5 + $0x268] sm:$0xf] }
  0x83   :  { %1641 = vmatpush.bf16.msrb.mxu1 %v3249_v35  ;;  %1654 = vmatpush.bf16.msrb.mxu2 %v2485_v36  ;;  %v2532_v35 = vld [vmem:[#allocation5 + $0x108] sm:$0xf]  ;;  %v3582_v36 = vld [vmem:[#allocation5 + $0x114] sm:$0xf0] }
  0x84   :  { %1667 = vmatpush.bf16.msrb.mxu3 %v2613_v43  ;;  %v3041_v43 = vor.u32 %v3707_v26, %v3038_v27  ;;  %v3662_v23 = vld [vmem:[#allocation5 + $0x394] sm:$0xf0]  ;;  %v3108_v26 = vld [vmem:[#allocation5 + $0x588] sm:$0xf] }
  0x85   :  { %1629 = vmatpush.bf16.msrb.mxu0 %v3105_v49  ;;  %v3156_v49 = vld [vmem:[#allocation5 + $0x5e8] sm:$0xf]  ;;  %v3726_v27 = vld [vmem:[#allocation5 + $0x594] sm:$0xf0] }
  0x86   :  { %v3626_v32 = vld [vmem:[#allocation5 + $0x274] sm:$0xf0]  ;;  %v3109_v34 = vor.u32 %v3726_v27, %v3108_v26  ;;  %v3092_v39 = vld [vmem:[#allocation5 + $0x568] sm:$0xf] }
  0x87   :  { %1642 = vmatpush.bf16.msrb.mxu1 %v3233_v50  ;;  %1655 = vmatpush.bf16.msrb.mxu2 %v2469_v51  ;;  %v3738_v50 = vld [vmem:[#allocation5 + $0x5f4] sm:$0xf0]  ;;  %v2533_v51 = vor.u32 %v3582_v36, %v2532_v35  ;;  %v2964_v36 = vld [vmem:[#allocation5 + $0x468] sm:$0xf] }
  0x88   :  { %1668 = vmatpush.bf16.msrb.mxu3 %v2597_v55  ;;  %v2756_v55 = vld [vmem:[#allocation5 + $0x2c8] sm:$0xf]  ;;  %v3157_v58 = vor.u32 %v3738_v50, %v3156_v49  ;;  %v3658_v35 = vld [vmem:[#allocation5 + $0x374] sm:$0xf0] }
  0x89   :  { %1630 = vmatpush.bf16.msrb.mxu0 %v3089_v61  ;;  %v3702_v61 = vld [vmem:[#allocation5 + $0x4d4] sm:$0xf0]  ;;  %v2757_v0 = vor.u32 %v3638_v56, %v2756_v55  ;;  %v2692_v46 = vld [vmem:[#allocation5 + $0x248] sm:$0xf] }
  0x8a   :  { %v3013_v2 = vor.u32 %v3702_v61, %v3012_v60  ;;  %v3690_v37 = vld [vmem:[#allocation5 + $0x474] sm:$0xf0]  ;;  %v2804_v60 = vld [vmem:[#allocation5 + $0x328] sm:$0xf] }
  0x8b   :  { %1643 = vmatpush.bf16.msrb.mxu1 %v3217_v62  ;;  %1656 = vmatpush.bf16.msrb.mxu2 %v2453_v63  ;;  %v3140_v62 = vld [vmem:[#allocation5 + $0x5c8] sm:$0xf]  ;;  %v3734_v63 = vld [vmem:[#allocation5 + $0x5d4] sm:$0xf0]  ;;  %v2965_v45 = vor.u32 %v3690_v37, %v2964_v36  ;;  %v3572_v36 = vld [vmem:[#allocation5 + $0xcc] sm:$0xf] }
  0x8c   :  { %1669 = vmatpush.bf16.msrb.mxu3 %v2581_v3  ;;  %v2740_v3 = vld [vmem:[#allocation5 + $0x2a8] sm:$0xf]  ;;  %v3141_v8 = vor.u32 %v3734_v63, %v3140_v62  ;;  %v3722_v40 = vld [vmem:[#allocation5 + $0x574] sm:$0xf0] }
  0x8d   :  { %1631 = vmatpush.bf16.msrb.mxu0 %v3073_v11  ;;  %v3698_v11 = vld [vmem:[#allocation5 + $0x4b4] sm:$0xf0]  ;;  %v2741_v14 = vor.u32 %v3634_v4, %v2740_v3  ;;  %v3093_v49 = vor.u32 %v3722_v40, %v3092_v39  ;;  %v2932_v63 = vld [vmem:[#allocation5 + $0x428] sm:$0xf]  ;;  %v2502_v39 = vld [vmem:[#allocation5 + $0xd8] sm:$0xf0] }
  0x8e   :  { %v2997_v16 = vor.u32 %v3698_v11, %v2996_v10  ;;  %v3654_v50 = vld [vmem:[#allocation5 + $0x354] sm:$0xf0]  ;;  %v2660_v4 = vld [vmem:[#allocation5 + $0x208] sm:$0xf]  ;;  %v3604_v40 = vld [vmem:[#allocation5 + $0x1cc] sm:$0xf] }
  0x8f   :  { %1644 = vmatpush.bf16.msrb.mxu1 %v3201_v12  ;;  %1657 = vmatpush.bf16.msrb.mxu2 %v2437_v13  ;;  %v3124_v12 = vld [vmem:[#allocation5 + $0x5a8] sm:$0xf]  ;;  %v3730_v13 = vld [vmem:[#allocation5 + $0x5b4] sm:$0xf0] }
  0x90   :  { %1670 = vmatpush.bf16.msrb.mxu3 %v2565_v17  ;;  %v2724_v17 = vld [vmem:[#allocation5 + $0x288] sm:$0xf]  ;;  %v3125_v20 = vor.u32 %v3730_v13, %v3124_v12  ;;  %v3618_v59 = vld [vmem:[#allocation5 + $0x234] sm:$0xf0] }
  0x91   :  { %1632 = vmatpush.bf16.msrb.mxu0 %v3057_v25  ;;  %v3694_v25 = vld [vmem:[#allocation5 + $0x494] sm:$0xf0]  ;;  %v2788_v10 = vld [vmem:[#allocation5 + $0x308] sm:$0xf] }
  0x92   :  { %v2981_v30 = vor.u32 %v3694_v25, %v2980_v24  ;;  %v3650_v62 = vld [vmem:[#allocation5 + $0x334] sm:$0xf0]  ;;  %v2916_v12 = vld [vmem:[#allocation5 + $0x408] sm:$0xf]  ;;  %v3608_v24 = vld [vmem:[#allocation5 + $0x1ec] sm:$0xf] }
  0x93   :  { %1645 = vmatpush.bf16.msrb.mxu1 %v3185_v28  ;;  %1658 = vmatpush.bf16.msrb.mxu2 %v2421_v29  ;;  %v2725_v28 = vor.u32 %v3630_v18, %v2724_v17  ;;  %v2853_v29 = vor.u32 %v3662_v23, %v2852_v19  ;;  %v3614_v6 = vld [vmem:[#allocation5 + $0x214] sm:$0xf0]  ;;  %v3284_v17 = vld [vmem:[#allocation5 + $0x6e8] sm:$0xf]  ;;  %v3576_v19 = vld [vmem:[#allocation5 + $0xec] sm:$0xf] }
  0x94   :  { %1671 = vmatpush.bf16.msrb.mxu3 %v2549_v33  ;;  %v2836_v33 = vld [vmem:[#allocation5 + $0x368] sm:$0xf]  ;;  %v3646_v11 = vld [vmem:[#allocation5 + $0x314] sm:$0xf0]  ;;  %v2518_v23 = vld [vmem:[#allocation5 + $0xf8] sm:$0xf0] }
  0x95   :  { %1633 = vmatpush.bf16.msrb.mxu0 %v3041_v43  ;;  %v2709_v43 = vor.u32 %v3626_v32, %v2708_v31  ;;  %v2837_v44 = vor.u32 %v3658_v35, %v2836_v33  ;;  %v3770_v18 = vld [vmem:[#allocation5 + $0x6f4] sm:$0xf0]  ;;  %v2646_v25 = vld [vmem:[#allocation5 + $0x1f8] sm:$0xf0]  ;;  %v2789_v26 = vor.u32 %v3646_v11, %v2788_v10  ;;  %v2521_v32 = vor.u32 %v3576_v19, %v2518_v23  ;;  %v3220_v11 = vld [vmem:[#allocation5 + $0x668] sm:$0xf] }
  0x96   :  { %v3285_v31 = vor.u32 %v3770_v18, %v3284_v17  ;;  %v2649_v33 = vor.u32 %v3608_v24, %v2646_v25  ;;  %v3766_v35 = vld [vmem:[#allocation5 + $0x6d4] sm:$0xf0]  ;;  %v2582_v17 = vld [vmem:[#allocation5 + $0x178] sm:$0xf0]  ;;  %v3624_v18 = vld [vmem:[#allocation5 + $0x26c] sm:$0xf] }
  0x97   :  { %1646 = vmatpush.bf16.msrb.mxu1 %v3169_v47  ;;  %1659 = vmatpush.bf16.msrb.mxu2 %v2405_v48  ;;  %v3622_v47 = vld [vmem:[#allocation5 + $0x254] sm:$0xf0]  ;;  %v2820_v48 = vld [vmem:[#allocation5 + $0x348] sm:$0xf]  ;;  %v2710_v19 = vld [vmem:[#allocation5 + $0x278] sm:$0xf0] }
  0x98   :  { %1672 = vmatpush.bf16.msrb.mxu3 %v2533_v51  ;;  %1634 = vmatmul.bf16.vlgmr.msrb.gmra.mxu0 %v4029_v42  ;;  %v2948_v51 = vld [vmem:[#allocation5 + $0x448] sm:$0xf]  ;;  %v2693_v55 = vor.u32 %v3622_v47, %v2692_v46  ;;  %v2821_v56 = vor.u32 %v3654_v50, %v2820_v48  ;;  %v2505_v47 = vor.u32 %v3572_v36, %v2502_v39  ;;  %v3762_v50 = vld [vmem:[#allocation5 + $0x6b4] sm:$0xf0] }
  0x99   :  { %1678 = vmatpush.bf16.msra.mxu0 %v2773_v52  ;;  %v3686_v52 = vld [vmem:[#allocation5 + $0x454] sm:$0xf0]  ;;  %v3204_v25 = vld [vmem:[#allocation5 + $0x648] sm:$0xf] }
  0x9a   :  { %1647 = vmatmul.bf16.vlgmr.msrb.gmra.mxu1 %v4025_v38  ;;  %1660 = vmatmul.bf16.vlgmr.msrb.gmra.mxu2 %v4018_v21  ;;  %v2949_v57 = vor.u32 %v3686_v52, %v2948_v51  ;;  %v3568_v51 = vld [vmem:[#allocation5 + $0xac] sm:$0xf] }
  0x9b   :  { %1691 = vmatpush.bf16.msra.mxu1 %v2901_v53  ;;  %1704 = vmatpush.bf16.msra.mxu2 %v3029_v54  ;;  %v3076_v53 = vld [vmem:[#allocation5 + $0x548] sm:$0xf]  ;;  %v3718_v54 = vld [vmem:[#allocation5 + $0x554] sm:$0xf0] }
  0x9c   :  { %1717 = vmatpush.bf16.msra.mxu3 %v3157_v58  ;;  %v2676_v58 = vld [vmem:[#allocation5 + $0x228] sm:$0xf]  ;;  %v3077_v61 = vor.u32 %v3718_v54, %v3076_v53  ;;  %v2486_v53 = vld [vmem:[#allocation5 + $0xb8] sm:$0xf0]  ;;  %v3600_v54 = vld [vmem:[#allocation5 + $0x1ac] sm:$0xf] }
  0x9d   :  { %1679 = vmatpush.bf16.msra.mxu0 %v2757_v0  ;;  %1673 = vmatmul.bf16.vlgmr.msrb.gmra.mxu3 %v4020_v22  ;;  %v3682_v0 = vld [vmem:[#allocation5 + $0x434] sm:$0xf0]  ;;  %v2677_v3 = vor.u32 %v3618_v59, %v2676_v58  ;;  %v2489_v59 = vor.u32 %v3568_v51, %v2486_v53  ;;  %v3616_v51 = vld [vmem:[#allocation5 + $0x22c] sm:$0xf] }
  0x9e   :  { %v2933_v9 = vor.u32 %v3682_v0, %v2932_v63  ;;  %v3564_v63 = vld [vmem:[#allocation5 + $0x8c] sm:$0xf] }
  0x9f   :  { %1692 = vmatpush.bf16.msra.mxu1 %v2885_v1  ;;  %1705 = vmatpush.bf16.msra.mxu2 %v3013_v2  ;;  %v3060_v1 = vld [vmem:[#allocation5 + $0x528] sm:$0xf]  ;;  %v3714_v2 = vld [vmem:[#allocation5 + $0x534] sm:$0xf0] }
  0xa0   :  { %1718 = vmatpush.bf16.msra.mxu3 %v3141_v8  ;;  %v2805_v8 = vor.u32 %v3650_v62, %v2804_v60  ;;  %v3061_v13 = vor.u32 %v3714_v2, %v3060_v1  ;;  %v3758_v62 = vld [vmem:[#allocation5 + $0x694] sm:$0xf0]  ;;  %v2470_v1 = vld [vmem:[#allocation5 + $0x98] sm:$0xf0]  ;;  %v3596_v2 = vld [vmem:[#allocation5 + $0x18c] sm:$0xf] }
  0xa1   :  { %1680 = vmatpush.bf16.msra.mxu0 %v2741_v14  ;;  %v3678_v14 = vld [vmem:[#allocation5 + $0x414] sm:$0xf0] }
  0xa2   :  { %v2917_v27 = vor.u32 %v3678_v14, %v2916_v12  ;;  %v3754_v12 = vld [vmem:[#allocation5 + $0x674] sm:$0xf0] }
  0xa3   :  { %1693 = vmatpush.bf16.msra.mxu1 %v2869_v15  ;;  %1706 = vmatpush.bf16.msra.mxu2 %v2997_v16  ;;  %v3044_v15 = vld [vmem:[#allocation5 + $0x508] sm:$0xf]  ;;  %v3710_v16 = vld [vmem:[#allocation5 + $0x514] sm:$0xf0] }
  0xa4   :  { %1719 = vmatpush.bf16.msra.mxu3 %v3125_v20  ;;  %v2661_v20 = vor.u32 %v3614_v6, %v2660_v4  ;;  %v3628_v4 = vld [vmem:[#allocation5 + $0x28c] sm:$0xf]  ;;  %v2726_v6 = vld [vmem:[#allocation5 + $0x298] sm:$0xf0] }
  0xa5   :  { %1681 = vmatpush.bf16.msra.mxu0 %v2725_v28  ;;  %v3640_v28 = vld [vmem:[#allocation5 + $0x2ec] sm:$0xf]  ;;  %v2729_v14 = vor.u32 %v3628_v4, %v2726_v6 }
  0xa7   :  { %1694 = vmatpush.bf16.msra.mxu1 %v2853_v29  ;;  %1707 = vmatpush.bf16.msra.mxu2 %v2981_v30  ;;  %v2774_v29 = vld [vmem:[#allocation5 + $0x2f8] sm:$0xf0]  ;;  %v3045_v30 = vor.u32 %v3710_v16, %v3044_v15  ;;  %v3592_v16 = vld [vmem:[#allocation5 + $0x16c] sm:$0xf] }
  0xa8   :  { %1720 = vmatpush.bf16.msra.mxu3 %v3109_v34  ;;  %v3268_v34 = vld [vmem:[#allocation5 + $0x6c8] sm:$0xf]  ;;  %v2777_v37 = vor.u32 %v3640_v28, %v2774_v29  ;;  %v2454_v15 = vld [vmem:[#allocation5 + $0x78] sm:$0xf0]  ;;  %v2585_v24 = vor.u32 %v3592_v16, %v2582_v17  ;;  %v2713_v28 = vor.u32 %v3624_v18, %v2710_v19 }
  0xa9   :  { %1682 = vmatpush.bf16.msra.mxu0 %v2709_v43  ;;  %v2630_v43 = vld [vmem:[#allocation5 + $0x1d8] sm:$0xf0]  ;;  %v3269_v46 = vor.u32 %v3766_v35, %v3268_v34 }
  0xaa   :  { %v2633_v48 = vor.u32 %v3604_v40, %v2630_v43  ;;  %v2438_v29 = vld [vmem:[#allocation5 + $0x58] sm:$0xf0]  ;;  %v3188_v40 = vld [vmem:[#allocation5 + $0x628] sm:$0xf]  ;;  %v3746_v43 = vld [vmem:[#allocation5 + $0x634] sm:$0xf0] }
  0xab   :  { %1695 = vmatpush.bf16.msra.mxu1 %v2837_v44  ;;  %1708 = vmatpush.bf16.msra.mxu2 %v2965_v45  ;;  %v3636_v44 = vld [vmem:[#allocation5 + $0x2cc] sm:$0xf]  ;;  %v2758_v45 = vld [vmem:[#allocation5 + $0x2d8] sm:$0xf0]  ;;  %v3189_v53 = vor.u32 %v3746_v43, %v3188_v40 }
  0xac   :  { %1721 = vmatpush.bf16.msra.mxu3 %v3093_v49  ;;  %v3252_v49 = vld [vmem:[#allocation5 + $0x6a8] sm:$0xf]  ;;  %v2761_v52 = vor.u32 %v3636_v44, %v2758_v45  ;;  %v3552_v44 = vld [vmem:[#allocation5 + $0x2c] sm:$0xf]  ;;  %v2870_v40 = vld [vmem:[#allocation5 + $0x3b8] sm:$0xf0] }
  0xad   :  { %1683 = vmatpush.bf16.msra.mxu0 %v2693_v55  ;;  %v2614_v55 = vld [vmem:[#allocation5 + $0x1b8] sm:$0xf0]  ;;  %v3253_v58 = vor.u32 %v3762_v50, %v3252_v49  ;;  %v3696_v43 = vld [vmem:[#allocation5 + $0x4ac] sm:$0xf] }
  0xae   :  { %v2617_v60 = vor.u32 %v3600_v54, %v2614_v55  ;;  %v2550_v49 = vld [vmem:[#allocation5 + $0x138] sm:$0xf0]  ;;  %v3172_v54 = vld [vmem:[#allocation5 + $0x608] sm:$0xf]  ;;  %v3742_v55 = vld [vmem:[#allocation5 + $0x614] sm:$0xf0] }
  0xaf   :  { %1696 = vmatpush.bf16.msra.mxu1 %v2821_v56  ;;  %1709 = vmatpush.bf16.msra.mxu2 %v2949_v57  ;;  %v3632_v56 = vld [vmem:[#allocation5 + $0x2ac] sm:$0xf]  ;;  %v2742_v57 = vld [vmem:[#allocation5 + $0x2b8] sm:$0xf0]  ;;  %v3173_v6 = vor.u32 %v3742_v55, %v3172_v54 }
  0xb0   :  { %1722 = vmatpush.bf16.msra.mxu3 %v3077_v61  ;;  %v3236_v61 = vld [vmem:[#allocation5 + $0x688] sm:$0xf]  ;;  %v2745_v0 = vor.u32 %v3632_v56, %v2742_v57  ;;  %v3660_v55 = vld [vmem:[#allocation5 + $0x38c] sm:$0xf] }
  0xb1   :  { %1684 = vmatpush.bf16.msra.mxu0 %v2677_v3  ;;  %v2598_v3 = vld [vmem:[#allocation5 + $0x198] sm:$0xf0] }
  0xb2   :  { %v2601_v10 = vor.u32 %v3596_v2, %v2598_v3  ;;  %v2902_v2 = vld [vmem:[#allocation5 + $0x3f8] sm:$0xf0]  ;;  %v3704_v3 = vld [vmem:[#allocation5 + $0x4ec] sm:$0xf] }
  0xb3   :  { %1697 = vmatpush.bf16.msra.mxu1 %v2805_v8  ;;  %1710 = vmatpush.bf16.msra.mxu2 %v2933_v9  ;;  %v3237_v8 = vor.u32 %v3758_v62, %v3236_v61  ;;  %v2473_v9 = vor.u32 %v3564_v63, %v2470_v1  ;;  %v2534_v62 = vld [vmem:[#allocation5 + $0x118] sm:$0xf0]  ;;  %v3612_v63 = vld [vmem:[#allocation5 + $0x20c] sm:$0xf] }
  0xb4   :  { %1723 = vmatpush.bf16.msra.mxu3 %v3061_v13  ;;  %v3560_v13 = vld [vmem:[#allocation5 + $0x6c] sm:$0xf] }
  0xb5   :  { %1685 = vmatpush.bf16.msra.mxu0 %v2661_v20  ;;  %v3221_v20 = vor.u32 %v3754_v12, %v3220_v11  ;;  %v2457_v23 = vor.u32 %v3560_v13, %v2454_v15  ;;  %v4047_v34 = vpop.f32.mrf.mxu0  ;;  %v3672_v1 = vld [vmem:[#allocation5 + $0x3ec] sm:$0xf]  ;;  %v3286_v15 = vld [vmem:[#allocation5 + $0x6f8] sm:$0xf0] }
  0xb6   :  { %v4049_v36 = vpop.f32.mrf.mxu1  ;;  %v2905_v18 = vor.u32 %v3672_v1, %v2902_v2  ;;  %v3656_v2 = vld [vmem:[#allocation5 + $0x36c] sm:$0xf] }
  0xb7   :  { %1698 = vmatpush.bf16.msra.mxu1 %v2789_v26  ;;  %1711 = vmatpush.bf16.msra.mxu2 %v2917_v27  ;;  %v3750_v26 = vld [vmem:[#allocation5 + $0x654] sm:$0xf0]  ;;  %v3556_v27 = vld [vmem:[#allocation5 + $0x4c] sm:$0xf] }
  0xb8   :  { %1724 = vmatpush.bf16.msra.mxu3 %v3045_v30  ;;  %1686 = vmatmul.bf16.vlgmr.msra.gmra.mxu0 %v4013_v5  ;;  %v3588_v30 = vld [vmem:[#allocation5 + $0x14c] sm:$0xf]  ;;  %v3205_v35 = vor.u32 %v3750_v26, %v3204_v25  ;;  %v2886_v25 = vld [vmem:[#allocation5 + $0x3d8] sm:$0xf0] }
  0xb9   :  { %1730 = vmatpush.bf16.msrb.mxu0 %v3285_v31  ;;  %v2566_v31 = vld [vmem:[#allocation5 + $0x158] sm:$0xf0]  ;;  %v3700_v26 = vld [vmem:[#allocation5 + $0x4cc] sm:$0xf] }
  0xba   :  { %1712 = vmatmul.bf16.vlgmr.msra.gmra.mxu2 %v4027_v41  ;;  %1699 = vmatmul.bf16.vlgmr.msra.gmra.mxu1 %v4015_v7  ;;  %v2569_v39 = vor.u32 %v3588_v30, %v2566_v31  ;;  %v3142_v30 = vld [vmem:[#allocation5 + $0x5d8] sm:$0xf0]  ;;  %v3764_v31 = vld [vmem:[#allocation5 + $0x6cc] sm:$0xf] }
  0xbb   :  { %1743 = vmatpush.bf16.msrb.mxu1 %v2521_v32  ;;  %1756 = vmatpush.bf16.msrb.mxu2 %v2649_v33  ;;  %v3620_v32 = vld [vmem:[#allocation5 + $0x24c] sm:$0xf]  ;;  %v2694_v33 = vld [vmem:[#allocation5 + $0x258] sm:$0xf0] }
  0xbc   :  { %1769 = vmatpush.bf16.msrb.mxu3 %v2777_v37  ;;  %v2441_v37 = vor.u32 %v3556_v27, %v2438_v29  ;;  %v3732_v29 = vld [vmem:[#allocation5 + $0x5cc] sm:$0xf] }
  0xbd   :  { %1725 = vmatmul.bf16.vlgmr.msra.gmra.mxu3 %v4029_v42  ;;  %1731 = vmatpush.bf16.msrb.mxu0 %v3269_v46  ;;  %v2697_v46 = vor.u32 %v3620_v32, %v2694_v33  ;;  %v1481_v4 = vpop.f32.mrf.mxu0  ;;  %v3270_v32 = vld [vmem:[#allocation5 + $0x6d8] sm:$0xf0] }
  0xbe   :  { %v1494_v11 = vpop.f32.mrf.mxu1  ;;  %v3688_v4 = vld [vmem:[#allocation5 + $0x46c] sm:$0xf] }
  0xbf   :  { %1744 = vmatpush.bf16.msrb.mxu1 %v2505_v47  ;;  %1757 = vmatpush.bf16.msrb.mxu2 %v2633_v48  ;;  %v2422_v47 = vld [vmem:[#allocation5 + $0x38] sm:$0xf0]  ;;  %v3584_v48 = vld [vmem:[#allocation5 + $0x12c] sm:$0xf] }
  0xc0   :  { %1770 = vmatpush.bf16.msrb.mxu3 %v2761_v52  ;;  %v2678_v52 = vld [vmem:[#allocation5 + $0x238] sm:$0xf0]  ;;  %v2425_v56 = vor.u32 %v3552_v44, %v2422_v47  ;;  %v2553_v57 = vor.u32 %v3584_v48, %v2550_v49  ;;  %v3273_v44 = vor.u32 %v3764_v31, %v3270_v32  ;;  %v3728_v47 = vld [vmem:[#allocation5 + $0x5ac] sm:$0xf] }
  0xc1   :  { %1732 = vmatpush.bf16.msrb.mxu0 %v3253_v58  ;;  %v3548_v58 = vld [vmem:[#allocation5 + $0xc] sm:$0xf]  ;;  %v2681_v61 = vor.u32 %v3616_v51, %v2678_v52  ;;  %v3126_v48 = vld [vmem:[#allocation5 + $0x5b8] sm:$0xf0] }
  0xc2   :  { %v3760_v49 = vld [vmem:[#allocation5 + $0x6ac] sm:$0xf]  ;;  %v3254_v51 = vld [vmem:[#allocation5 + $0x6b8] sm:$0xf0]  ;;  %v3129_v54 = vor.u32 %v3728_v47, %v3126_v48 }
  0xc3   :  { %1745 = vmatpush.bf16.msrb.mxu1 %v2489_v59  ;;  %1758 = vmatpush.bf16.msrb.mxu2 %v2617_v60  ;;  %v2406_v59 = vld [vmem:[#allocation5 + $0x18] sm:$0xf0]  ;;  %v3580_v60 = vld [vmem:[#allocation5 + $0x10c] sm:$0xf] }
  0xc4   :  { %1771 = vmatpush.bf16.msrb.mxu3 %v2745_v0  ;;  %v2662_v0 = vld [vmem:[#allocation5 + $0x218] sm:$0xf0]  ;;  %v2409_v12 = vor.u32 %v3548_v58, %v2406_v59  ;;  %v2537_v13 = vor.u32 %v3580_v60, %v2534_v62  ;;  %v3257_v58 = vor.u32 %v3760_v49, %v3254_v51  ;;  %v3724_v60 = vld [vmem:[#allocation5 + $0x58c] sm:$0xf] }
  0xc5   :  { %1733 = vmatpush.bf16.msrb.mxu0 %v3237_v8  ;;  %v4051_v45 = vpop.f32.mrf.mxu2  ;;  %v4053_v50 = vpop.f32.mrf.mxu3  ;;  %v3030_v8 = vld [vmem:[#allocation5 + $0x4f8] sm:$0xf0]  ;;  %v2665_v17 = vor.u32 %v3612_v63, %v2662_v0  ;;  %v3752_v11 = vld [vmem:[#allocation5 + $0x66c] sm:$0xf] }
  0xc6   :  { %v2982_v59 = vld [vmem:[#allocation5 + $0x498] sm:$0xf0]  ;;  %v3712_v47 = vld [vmem:[#allocation5 + $0x52c] sm:$0xf] }
  0xc7   :  { %1746 = vmatpush.bf16.msrb.mxu1 %v2473_v9  ;;  %1759 = vmatpush.bf16.msrb.mxu2 %v2601_v10  ;;  %v3736_v9 = vld [vmem:[#allocation5 + $0x5ec] sm:$0xf]  ;;  %v3158_v10 = vld [vmem:[#allocation5 + $0x5f8] sm:$0xf0] }
  0xc8   :  { %1772 = vmatpush.bf16.msrb.mxu3 %v2729_v14  ;;  %v3768_v14 = vld [vmem:[#allocation5 + $0x6ec] sm:$0xf]  ;;  %v3238_v62 = vld [vmem:[#allocation5 + $0x698] sm:$0xf0] }
  0xc9   :  { %1734 = vmatpush.bf16.msrb.mxu0 %v3221_v20  ;;  %v3033_v20 = vor.u32 %v3704_v3, %v3030_v8  ;;  %v3289_v27 = vor.u32 %v3768_v14, %v3286_v15  ;;  %v2838_v3 = vld [vmem:[#allocation5 + $0x378] sm:$0xf0]  ;;  %v3744_v49 = vld [vmem:[#allocation5 + $0x62c] sm:$0xf] }
  0xca   :  { %v2966_v8 = vld [vmem:[#allocation5 + $0x478] sm:$0xf0]  ;;  %v2841_v14 = vor.u32 %v3656_v2, %v2838_v3 }
  0xcb   :  { %1747 = vmatpush.bf16.msrb.mxu1 %v2457_v23  ;;  %1760 = vmatpush.bf16.msrb.mxu2 %v2585_v24  ;;  %v3161_v23 = vor.u32 %v3736_v9, %v3158_v10  ;;  %v3668_v24 = vld [vmem:[#allocation5 + $0x3cc] sm:$0xf]  ;;  %v3094_v10 = vld [vmem:[#allocation5 + $0x578] sm:$0xf0]  ;;  %v2969_v15 = vor.u32 %v3688_v4, %v2966_v8 }
  0xcc   :  { %1773 = vmatpush.bf16.msrb.mxu3 %v2713_v28  ;;  %v3014_v28 = vld [vmem:[#allocation5 + $0x4d8] sm:$0xf0]  ;;  %v2889_v33 = vor.u32 %v3668_v24, %v2886_v25  ;;  %v3720_v9 = vld [vmem:[#allocation5 + $0x56c] sm:$0xf] }
  0xcd   :  { %1735 = vmatpush.bf16.msrb.mxu0 %v3205_v35  ;;  %v1507_v16 = vpop.f32.mrf.mxu2  ;;  %v1520_v19 = vpop.f32.mrf.mxu3  ;;  %v3017_v35 = vor.u32 %v3700_v26, %v3014_v28  ;;  %v2950_v24 = vld [vmem:[#allocation5 + $0x458] sm:$0xf0]  ;;  %v3716_v25 = vld [vmem:[#allocation5 + $0x54c] sm:$0xf] }
  0xce   :  { %v3097_v16 = vor.u32 %v3720_v9, %v3094_v10  ;;  %v3684_v19 = vld [vmem:[#allocation5 + $0x44c] sm:$0xf]  ;;  %v3078_v26 = vld [vmem:[#allocation5 + $0x558] sm:$0xf0] }
  0xcf   :  { %1748 = vmatpush.bf16.msrb.mxu1 %v2441_v37  ;;  %1761 = vmatpush.bf16.msrb.mxu2 %v2569_v39  ;;  %v3145_v37 = vor.u32 %v3732_v29, %v3142_v30  ;;  %v3664_v39 = vld [vmem:[#allocation5 + $0x3ac] sm:$0xf]  ;;  %v3206_v28 = vld [vmem:[#allocation5 + $0x658] sm:$0xf0] }
  0xd0   :  { %1774 = vmatpush.bf16.msrb.mxu3 %v2697_v46  ;;  %v2998_v46 = vld [vmem:[#allocation5 + $0x4b8] sm:$0xf0]  ;;  %v2873_v52 = vor.u32 %v3664_v39, %v2870_v40  ;;  %v3648_v39 = vld [vmem:[#allocation5 + $0x32c] sm:$0xf] }
  0xd1   :  { %1736 = vmatpush.bf16.msrb.mxu0 %v3189_v53  ;;  %v3001_v53 = vor.u32 %v3696_v43, %v2998_v46  ;;  %v2806_v40 = vld [vmem:[#allocation5 + $0x338] sm:$0xf0]  ;;  %v3680_v43 = vld [vmem:[#allocation5 + $0x42c] sm:$0xf] }
  0xd2   :  { %v2934_v46 = vld [vmem:[#allocation5 + $0x438] sm:$0xf0] }
  0xd3   :  { %1749 = vmatpush.bf16.msrb.mxu1 %v2425_v56  ;;  %1762 = vmatpush.bf16.msrb.mxu2 %v2553_v57  ;;  %v2854_v56 = vld [vmem:[#allocation5 + $0x398] sm:$0xf0]  ;;  %v3692_v57 = vld [vmem:[#allocation5 + $0x48c] sm:$0xf] }
  0xd4   :  { %1775 = vmatpush.bf16.msrb.mxu3 %v2681_v61  ;;  %v3756_v61 = vld [vmem:[#allocation5 + $0x68c] sm:$0xf]  ;;  %v3062_v48 = vld [vmem:[#allocation5 + $0x538] sm:$0xf0] }
  0xd5   :  { %1737 = vmatpush.bf16.msrb.mxu0 %v3173_v6  ;;  %v4059_v63 = vpop.f32.mrf.mxu0  ;;  %v3241_v6 = vor.u32 %v3756_v61, %v3238_v62  ;;  %v3190_v51 = vld [vmem:[#allocation5 + $0x638] sm:$0xf0]  ;;  %v3708_v61 = vld [vmem:[#allocation5 + $0x50c] sm:$0xf] }
  0xd6   :  { %v3046_v62 = vld [vmem:[#allocation5 + $0x518] sm:$0xf0] }
  0xd7   :  { %1750 = vmatpush.bf16.msrb.mxu1 %v2409_v12  ;;  %1763 = vmatpush.bf16.msrb.mxu2 %v2537_v13  ;;  %v4061_v0 = vpop.f32.mrf.mxu1  ;;  %v3222_v12 = vld [vmem:[#allocation5 + $0x678] sm:$0xf0]  ;;  %v4063_v13 = vld [vmem:[#allocation7] sm:$0xf]  ;;  %v3049_v10 = vor.u32 %v3708_v61, %v3046_v62 }
  0xd8   :  { %1776 = vmatpush.bf16.msrb.mxu3 %v2665_v17  ;;  %1738 = vmatmul.bf16.vlgmr.msrb.gmra.mxu0 %v4025_v38  ;;  %v3652_v17 = vld [vmem:[#allocation5 + $0x34c] sm:$0xf]  ;;  %v317_v30 = vperm.slane %v4063_v13, 0  ;;  %v3786_v2 = vld [vmem:[#allocation8 + $0x74] sm:$0xf0] }
  0xd9   :  { %1782 = vmatpush.bf16.msra.mxu0 %v2905_v18  ;;  %v2822_v18 = vld [vmem:[#allocation5 + $0x358] sm:$0xf0] }
  0xda   :  { %1764 = vmatmul.bf16.vlgmr.msrb.gmra.mxu2 %v4020_v22  ;;  %1751 = vmatmul.bf16.vlgmr.msrb.gmra.mxu1 %v4018_v21  ;;  %v3110_v22 = vld [vmem:[#allocation5 + $0x598] sm:$0xf0]  ;;  %v2985_v21 = vor.u32 %v3692_v57, %v2982_v59  ;;  %v2825_v31 = vor.u32 %v3652_v17, %v2822_v18  ;;  %v3676_v57 = vld [vmem:[#allocation5 + $0x40c] sm:$0xf]  ;;  %v3404_v17 = vld [vmem:[#allocation8 + $0xe0] sm:$0xf] }
  0xdb   :  { %1795 = vmatpush.bf16.msra.mxu1 %v3033_v20  ;;  %1808 = vmatpush.bf16.msra.mxu2 %v3161_v23  ;;  %v3113_v1 = vor.u32 %v3724_v60, %v3110_v22  ;;  %v3225_v23 = vor.u32 %v3752_v11, %v3222_v12  ;;  %v1480_v60 = vadd.f32 %v4047_v34, %v317_v30  ;;  %v3802_v8 = vld [vmem:[#allocation8 + $0xf4] sm:$0xf0]  ;;  %v3800_v18 = vld [vmem:[#allocation8 + $0xe4] sm:$0xf0]  ;;  %v3324_v30 = vld [vmem:[#allocation8 + $0x40] sm:$0xf] }
  0xdc   :  { %1821 = vmatpush.bf16.msra.mxu3 %v3289_v27  ;;  %v3748_v27 = vld [vmem:[#allocation5 + $0x64c] sm:$0xf]  ;;  %v3193_v22 = vor.u32 %v3744_v49, %v3190_v51  ;;  %v3790_v61 = vld [vmem:[#allocation8 + $0x94] sm:$0xf0] }
  0xdd   :  { %1777 = vmatmul.bf16.vlgmr.msrb.gmra.mxu3 %v4013_v5  ;;  %1783 = vmatpush.bf16.msra.mxu0 %v2889_v33  ;;  %v2857_v5 = vor.u32 %v3660_v55, %v2854_v56  ;;  %v4065_v20 = vpop.f32.mrf.mxu2  ;;  %v1533_v32 = vpop.f32.mrf.mxu0  ;;  %v3065_v55 = vor.u32 %v3712_v47, %v3062_v48  ;;  %v2790_v56 = vld [vmem:[#allocation5 + $0x318] sm:$0xf0]  ;;  %v1493_v11 = vadd.f32 %v4049_v36, %v1480_v60  ;;  %v3332_v36 = vld [vmem:[#allocation8 + $0x50] sm:$0xf]  ;;  %v3308_v47 = vld [vmem:[#allocation8 + $0x20] sm:$0xf] }
  0xde   :  { %v3388_v32 = vld [vmem:[#allocation8 + $0xc0] sm:$0xf]  ;;  %v3776_v48 = vld [vmem:[#allocation8 + $0x24] sm:$0xf0] }
  0xdf   :  { %1796 = vmatpush.bf16.msra.mxu1 %v3017_v35  ;;  %1809 = vmatpush.bf16.msra.mxu2 %v3145_v37  ;;  %v1546_v33 = vpop.f32.mrf.mxu1  ;;  %v2953_v35 = vor.u32 %v3684_v19, %v2950_v24  ;;  %v3081_v37 = vor.u32 %v3716_v25, %v3078_v26  ;;  %v1506_v19 = vadd.f32 %v4051_v45, %v1493_v11  ;;  %v3782_v24 = vld [vmem:[#allocation8 + $0x54] sm:$0xf0]  ;;  %v3396_v26 = vld [vmem:[#allocation8 + $0xd0] sm:$0xf]  ;;  %v3801_v11 = vld [vmem:[#allocation8 + $0xf4] sm:$0xf] }
  0xe0   :  { %1822 = vmatpush.bf16.msra.mxu3 %v3273_v44  ;;  %v4067_v29 = vpop.f32.mrf.mxu3  ;;  %v3209_v44 = vor.u32 %v3748_v27, %v3206_v28  ;;  %v3405_v25 = vor.u32 %v3800_v18, %v3404_v17  ;;  %v3798_v27 = vld [vmem:[#allocation8 + $0xd4] sm:$0xf0]  ;;  %v3333_v45 = vor.u32 %v3782_v24, %v3332_v36  ;;  %v3796_v33 = vld [vmem:[#allocation8 + $0xc4] sm:$0xf0]  ;;  %v3783_v17 = vld [vmem:[#allocation8 + $0x64] sm:$0xf] }
  0xe1   :  { %1784 = vmatpush.bf16.msra.mxu0 %v2873_v52  ;;  %v2809_v52 = vor.u32 %v3648_v39, %v2806_v40  ;;  %v1519_v28 = vadd.f32 %v4053_v50, %v1506_v19  ;;  %v3778_v39 = vld [vmem:[#allocation8 + $0x34] sm:$0xf0]  ;;  %v3389_v40 = vor.u32 %v3796_v33, %v3388_v32  ;;  %v3342_v18 = vld [vmem:[#allocation8 + $0x68] sm:$0xf0]  ;;  %v3816_v33 = vld [vmem:[#allocation8 + $0x164] sm:$0xf0] }
  0xe2   :  { %v3794_v50 = vld [vmem:[#allocation8 + $0xb4] sm:$0xf0]  ;;  %v3406_v36 = vld [vmem:[#allocation8 + $0xe8] sm:$0xf0] }
  0xe3   :  { %1797 = vmatpush.bf16.msra.mxu1 %v3001_v53  ;;  %1810 = vmatpush.bf16.msra.mxu2 %v3129_v54  ;;  %v3644_v53 = vld [vmem:[#allocation5 + $0x30c] sm:$0xf]  ;;  %v2937_v54 = vor.u32 %v3680_v43, %v2934_v46  ;;  %v3380_v43 = vld [vmem:[#allocation8 + $0xb0] sm:$0xf] }
  0xe4   :  { %1823 = vmatpush.bf16.msra.mxu3 %v3257_v58  ;;  %v2918_v58 = vld [vmem:[#allocation5 + $0x418] sm:$0xf0]  ;;  %v2793_v4 = vor.u32 %v3644_v53, %v2790_v56  ;;  %v3381_v49 = vor.u32 %v3794_v50, %v3380_v43  ;;  %v3792_v53 = vld [vmem:[#allocation8 + $0xa4] sm:$0xf0]  ;;  %v3309_v56 = vor.u32 %v3776_v48, %v3308_v47  ;;  %v3779_v43 = vld [vmem:[#allocation8 + $0x44] sm:$0xf] }
  0xe5   :  { %1785 = vmatpush.bf16.msra.mxu0 %v2857_v5  ;;  %v1559_v59 = vpop.f32.mrf.mxu2  ;;  %v3740_v5 = vld [vmem:[#allocation5 + $0x60c] sm:$0xf]  ;;  %v2921_v9 = vor.u32 %v3676_v57, %v2918_v58  ;;  %v3774_v58 = vld [vmem:[#allocation8 + $0x14] sm:$0xf0]  ;;  %v3326_v50 = vld [vmem:[#allocation8 + $0x48] sm:$0xf0] }
  0xe6   :  { %v3390_v47 = vld [vmem:[#allocation8 + $0xc8] sm:$0xf0] }
  0xe7   :  { %1798 = vmatpush.bf16.msra.mxu1 %v2985_v21  ;;  %1811 = vmatpush.bf16.msra.mxu2 %v3113_v1  ;;  %v3174_v21 = vld [vmem:[#allocation5 + $0x618] sm:$0xf0]  ;;  %v3348_v1 = vld [vmem:[#allocation8 + $0x70] sm:$0xf] }
  0xe8   :  { %1824 = vmatpush.bf16.msra.mxu3 %v3241_v6  ;;  %v1572_v3 = vpop.f32.mrf.mxu3  ;;  %v3412_v6 = vld [vmem:[#allocation8 + $0xf0] sm:$0xf]  ;;  %v3177_v34 = vor.u32 %v3740_v5, %v3174_v21  ;;  %v3349_v12 = vor.u32 %v3786_v2, %v3348_v1  ;;  %v3292_v1 = vld [vmem:[#allocation8] sm:$0xf]  ;;  %v3785_v2 = vld [vmem:[#allocation8 + $0x74] sm:$0xf] }
  0xe9   :  { %1786 = vmatpush.bf16.msra.mxu0 %v2841_v14  ;;  %v3340_v14 = vld [vmem:[#allocation8 + $0x60] sm:$0xf] }
  0xeb   :  { %1799 = vmatpush.bf16.msra.mxu1 %v2969_v15  ;;  %1812 = vmatpush.bf16.msra.mxu2 %v3097_v16  ;;  %v3784_v15 = vld [vmem:[#allocation8 + $0x64] sm:$0xf0]  ;;  %v3413_v16 = vor.u32 %v3802_v8, %v3412_v6  ;;  %v3350_v6 = vld [vmem:[#allocation8 + $0x78] sm:$0xf0]  ;;  %v3356_v8 = vld [vmem:[#allocation8 + $0x80] sm:$0xf] }
  0xec   :  { %1825 = vmatpush.bf16.msra.mxu3 %v3225_v23  ;;  %v3341_v23 = vor.u32 %v3784_v15, %v3340_v14  ;;  %v3353_v15 = vor.u32 %v3785_v2, %v3350_v6 }
  0xed   :  { %1787 = vmatpush.bf16.msra.mxu0 %v2825_v31  ;;  %v3780_v31 = vld [vmem:[#allocation8 + $0x44] sm:$0xf0] }
  0xef   :  { %1800 = vmatpush.bf16.msra.mxu1 %v2953_v35  ;;  %1813 = vmatpush.bf16.msra.mxu2 %v3081_v37  ;;  %v1532_v35 = vadd.f32 %v4059_v63, %v1519_v28  ;;  %v3345_v28 = vor.u32 %v3783_v17, %v3342_v18 }
  0xf0   :  { %1826 = vmatpush.bf16.msra.mxu3 %v3209_v44 }
  0xf1   :  { %1788 = vmatpush.bf16.msra.mxu0 %v2809_v52  ;;  %v1545_v44 = vadd.f32 %v4061_v0, %v1532_v35  ;;  %v3372_v52 = vld [vmem:[#allocation8 + $0xa0] sm:$0xf]  ;;  %v3300_v0 = vld [vmem:[#allocation8 + $0x10] sm:$0xf]  ;;  %v3797_v35 = vld [vmem:[#allocation8 + $0xd4] sm:$0xf] }
  0xf2   :  { %v3373_v59 = vor.u32 %v3792_v53, %v3372_v52  ;;  %v3301_v21 = vor.u32 %v3774_v58, %v3300_v0  ;;  %v3452_v52 = vld [vmem:[#allocation8 + $0x140] sm:$0xf]  ;;  %v3812_v53 = vld [vmem:[#allocation8 + $0x144] sm:$0xf0]  ;;  %v3318_v0 = vld [vmem:[#allocation8 + $0x38] sm:$0xf0] }
  0xf3   :  { %1801 = vmatpush.bf16.msra.mxu1 %v2937_v54  ;;  %1814 = vmatpush.bf16.msra.mxu2 %v3065_v55  ;;  %v1558_v54 = vadd.f32 %v4065_v20, %v1545_v44  ;;  %v318_v55 = vperm.slane %v4063_v13, 1  ;;  %v3772_v20 = vld [vmem:[#allocation8 + $0x4] sm:$0xf0] }
  0xf4   :  { %1827 = vmatpush.bf16.msra.mxu3 %v3193_v22  ;;  %v3364_v22 = vld [vmem:[#allocation8 + $0x90] sm:$0xf]  ;;  %v3293_v14 = vor.u32 %v3772_v20, %v3292_v1  ;;  %v3310_v20 = vld [vmem:[#allocation8 + $0x28] sm:$0xf0] }
  0xf5   :  { %1789 = vmatpush.bf16.msra.mxu0 %v2793_v4  ;;  %v1583_v37 = vpop.f32.mrf.mxu0  ;;  %v1838_v62 = vmul.f32 0.2, %v1558_v54  ;;  %v1571_v5 = vadd.f32 %v4067_v29, %v318_v55  ;;  %v3365_v3 = vor.u32 %v3790_v61, %v3364_v22  ;;  %vm1834_vm0 = vcmp.gt.f32.partialorder %v1558_v54, 0.0 }
  0xf6   :  { %v3329_v55 = vor.u32 %v3779_v43, %v3326_v50  ;;  %v3453_v22 = vor.u32 %v3812_v53, %v3452_v52  ;;  %v3813_v52 = vld [vmem:[#allocation8 + $0x154] sm:$0xf] }
  0xf7   :  { %1802 = vmatpush.bf16.msra.mxu1 %v2921_v9  ;;  %1815 = vmatpush.bf16.msra.mxu2 %v3049_v10  ;;  %v3788_v9 = vld [vmem:[#allocation8 + $0x84] sm:$0xf0] }
  0xf8   :  { %1828 = vmatpush.bf16.msra.mxu3 %v3177_v34  ;;  %1790 = vmatmul.bf16.vlgmr.msra.gmra.mxu0 %v4015_v7  ;;  %v3397_v7 = vor.u32 %v3798_v27, %v3396_v26  ;;  %v3414_v34 = vld [vmem:[#allocation8 + $0xf8] sm:$0xf0]  ;;  %v3357_v29 = vor.u32 %v3788_v9, %v3356_v8  ;;  %v3818_v26 = vld [vmem:[#allocation8 + $0x174] sm:$0xf0] }
  0xf9   :  { %2240 = vmatpush.bf16.msrb.mxu0 %v3349_v12  ;;  %v1584_v12 = vadd.f32 %v1583_v37, %v1571_v5  ;;  %v3417_v19 = vor.u32 %v3801_v11, %v3414_v34  ;;  %v3810_v5 = vld [vmem:[#allocation8 + $0x134] sm:$0xf0]  ;;  %v3808_v11 = vld [vmem:[#allocation8 + $0x124] sm:$0xf0] }
  0xfa   :  { %1803 = vmatmul.bf16.vlgmr.msra.gmra.mxu1 %v4027_v41  ;;  %1816 = vmatmul.bf16.vlgmr.msra.gmra.mxu2 %v4029_v42  ;;  %v3325_v41 = vor.u32 %v3780_v31, %v3324_v30  ;;  %v3316_v42 = vld [vmem:[#allocation8 + $0x30] sm:$0xf]  ;;  %v3468_v30 = vld [vmem:[#allocation8 + $0x160] sm:$0xf]  ;;  %v3781_v31 = vld [vmem:[#allocation8 + $0x54] sm:$0xf] }
  0xfb   :  { %2253 = vmatpush.bf16.msrb.mxu1 %v3413_v16  ;;  %1829 = vmatmul.bf16.vlgmr.msra.gmra.mxu3 %v4025_v38  ;;  %v1596_v38 = vpop.f32.mrf.mxu1  ;;  %v3317_v46 = vor.u32 %v3778_v39, %v3316_v42  ;;  %v1842_v16 = vsel %vm1834_vm0, %v1558_v54, %v1838_v62  ;;  %v3469_v37 = vor.u32 %v3816_v33, %v3468_v30  ;;  %v3460_v39 = vld [vmem:[#allocation8 + $0x150] sm:$0xf] }
  0xfc   :  { %v1597_v24 = vadd.f32 %v1596_v38, %v1584_v12  ;;  %v4087_v27 = vpack.c.bf16 %v1842_v16, %v1842_v16  ;;  %v3444_v62 = vld [vmem:[#allocation8 + $0x130] sm:$0xf]  ;;  %v3302_v16 = vld [vmem:[#allocation8 + $0x18] sm:$0xf0] }
  0xfd   :  { %2241 = vmatpush.bf16.msrb.mxu0 %v3341_v23  ;;  %v4080_v51 = vpop.f32.mrf.mxu2  ;;  %v1585_v57 = vpop.f32.mrf.mxu0  ;;  %v3799_v23 = vld [vmem:[#allocation8 + $0xe4] sm:$0xf]  ;;  %v3445_v6 = vor.u32 %v3810_v5, %v3444_v62  ;;  %v3524_v62 = vld [vmem:[#allocation8 + $0x1d0] sm:$0xf]  ;;  %v3830_v5 = vld [vmem:[#allocation8 + $0x1d4] sm:$0xf0] }
  0xfe   :  { %v3409_v32 = vor.u32 %v3799_v23, %v3406_v36  ;;  %v1610_v42 = vadd.f32 %v4080_v51, %v1597_v24  ;;  %v3777_v57 = vld [vmem:[#allocation8 + $0x34] sm:$0xf]  ;;  %v3366_v23 = vld [vmem:[#allocation8 + $0x98] sm:$0xf0]  ;;  %v3428_v24 = vld [vmem:[#allocation8 + $0x110] sm:$0xf] }
  0xff   :  { %2254 = vmatpush.bf16.msrb.mxu1 %v3405_v25  ;;  %v3476_v25 = vld [vmem:[#allocation8 + $0x170] sm:$0xf] }
 0x100   :  { %v4082_v63 = vpop.f32.mrf.mxu3 }
 0x101   :  { %2242 = vmatpush.bf16.msrb.mxu0 %v3333_v45  ;;  %v3477_v45 = vor.u32 %v3818_v26, %v3476_v25  ;;  %v3806_v25 = vld [vmem:[#allocation8 + $0x114] sm:$0xf0] }
 0x103   :  { %2255 = vmatpush.bf16.msrb.mxu1 %v3397_v7  ;;  %v1598_v60 = vpop.f32.mrf.mxu1  ;;  %v3334_v7 = vld [vmem:[#allocation8 + $0x58] sm:$0xf0]  ;;  %2266 = vmatpush.bf16.msrb.mxu2 %v3477_v45  ;;  %v3294_v45 = vld [vmem:[#allocation8 + $0x8] sm:$0xf0] }
 0x104   :  { %v3337_v38 = vor.u32 %v3781_v31, %v3334_v7  ;;  %v3382_v60 = vld [vmem:[#allocation8 + $0xb8] sm:$0xf0]  ;;  %v3787_v31 = vld [vmem:[#allocation8 + $0x84] sm:$0xf]  ;;  %v3358_v7 = vld [vmem:[#allocation8 + $0x88] sm:$0xf0] }
 0x105   :  { %2243 = vmatpush.bf16.msrb.mxu0 %v3325_v41  ;;  %v1611_v4 = vpop.f32.mrf.mxu2  ;;  %v3398_v41 = vld [vmem:[#allocation8 + $0xd8] sm:$0xf0] }
 0x106   :  { %v3401_v44 = vor.u32 %v3797_v35, %v3398_v41  ;;  %v3374_v4 = vld [vmem:[#allocation8 + $0xa8] sm:$0xf0]  ;;  %v3420_v35 = vld [vmem:[#allocation8 + $0x100] sm:$0xf]  ;;  %v3804_v41 = vld [vmem:[#allocation8 + $0x104] sm:$0xf0] }
 0x107   :  { %2256 = vmatpush.bf16.msrb.mxu1 %v3389_v40  ;;  %v3814_v40 = vld [vmem:[#allocation8 + $0x154] sm:$0xf0]  ;;  %2267 = vmatpush.bf16.msrb.mxu2 %v3469_v37  ;;  %v3421_v43 = vor.u32 %v3804_v41, %v3420_v35 }
 0x108   :  { %v1624_v10 = vpop.f32.mrf.mxu3  ;;  %v3461_v48 = vor.u32 %v3814_v40, %v3460_v39  ;;  %v3817_v39 = vld [vmem:[#allocation8 + $0x174] sm:$0xf]  ;;  %v3478_v40 = vld [vmem:[#allocation8 + $0x178] sm:$0xf0] }
 0x109   :  { %2244 = vmatpush.bf16.msrb.mxu0 %v3317_v46  ;;  %v3795_v46 = vld [vmem:[#allocation8 + $0xc4] sm:$0xf]  ;;  %v3436_v10 = vld [vmem:[#allocation8 + $0x120] sm:$0xf]  ;;  %v3481_v50 = vor.u32 %v3817_v39, %v3478_v40  ;;  %v3833_v40 = vld [vmem:[#allocation8 + $0x1f4] sm:$0xf] }
 0x10a   :  { %v3393_v58 = vor.u32 %v3795_v46, %v3390_v47  ;;  %v3437_v36 = vor.u32 %v3808_v11, %v3436_v10  ;;  %v3470_v46 = vld [vmem:[#allocation8 + $0x168] sm:$0xf0] }
 0x10b   :  { %2257 = vmatpush.bf16.msrb.mxu1 %v3381_v49  ;;  %v1623_v49 = vadd.f32 %v4082_v63, %v1610_v42  ;;  %2268 = vmatpush.bf16.msrb.mxu2 %v3461_v48  ;;  %v3321_v63 = vor.u32 %v3777_v57, %v3318_v0  ;;  %v3540_v48 = vld [vmem:[#allocation8 + $0x1f0] sm:$0xf]  ;;  %v3532_v57 = vld [vmem:[#allocation8 + $0x1e0] sm:$0xf]  ;;  %v3832_v0 = vld [vmem:[#allocation8 + $0x1e4] sm:$0xf0] }
 0x10d   :  { %2245 = vmatpush.bf16.msrb.mxu0 %v3309_v56 }
 0x10f   :  { %2258 = vmatpush.bf16.msrb.mxu1 %v3373_v59  ;;  %v3793_v59 = vld [vmem:[#allocation8 + $0xb4] sm:$0xf]  ;;  %2269 = vmatpush.bf16.msrb.mxu2 %v3453_v22  ;;  %v319_v22 = vperm.slane %v4063_v13, 2 }
 0x110   :  { %v3385_v2 = vor.u32 %v3793_v59, %v3382_v60  ;;  %v3533_v59 = vor.u32 %v3832_v0, %v3532_v57  ;;  %v3454_v60 = vld [vmem:[#allocation8 + $0x148] sm:$0xf0] }
 0x111   :  { %2246 = vmatpush.bf16.msrb.mxu0 %v3301_v21  ;;  %v3775_v21 = vld [vmem:[#allocation8 + $0x24] sm:$0xf] }
 0x112   :  { %v3313_v12 = vor.u32 %v3775_v21, %v3310_v20  ;;  %v3525_v21 = vor.u32 %v3830_v5, %v3524_v62  ;;  %v3446_v20 = vld [vmem:[#allocation8 + $0x138] sm:$0xf0]  ;;  %v3825_v62 = vld [vmem:[#allocation8 + $0x1b4] sm:$0xf] }
 0x113   :  { %2259 = vmatpush.bf16.msrb.mxu1 %v3365_v3  ;;  %v3791_v3 = vld [vmem:[#allocation8 + $0xa4] sm:$0xf]  ;;  %2270 = vmatpush.bf16.msrb.mxu2 %v3445_v6  ;;  %v3510_v5 = vld [vmem:[#allocation8 + $0x1b8] sm:$0xf0] }
 0x114   :  { %v3377_v17 = vor.u32 %v3791_v3, %v3374_v4  ;;  %v3516_v3 = vld [vmem:[#allocation8 + $0x1c0] sm:$0xf]  ;;  %v3828_v4 = vld [vmem:[#allocation8 + $0x1c4] sm:$0xf0]  ;;  %v3807_v6 = vld [vmem:[#allocation8 + $0x124] sm:$0xf] }
 0x115   :  { %2247 = vmatpush.bf16.msrb.mxu0 %v3293_v14  ;;  %v1635_v54 = vpop.f32.mrf.mxu0  ;;  %v3517_v11 = vor.u32 %v3828_v4, %v3516_v3  ;;  %v320_v4 = vperm.slane %v4063_v13, 3 }
 0x116   :  { %v1636_v51 = vadd.f32 %v1635_v54, %v1623_v49  ;;  %v3834_v49 = vld [vmem:[#allocation8 + $0x1f4] sm:$0xf0]  ;;  %v3462_v54 = vld [vmem:[#allocation8 + $0x158] sm:$0xf0] }
 0x117   :  { %2260 = vmatpush.bf16.msrb.mxu1 %v3357_v29  ;;  %v1648_v56 = vpop.f32.mrf.mxu1  ;;  %v3773_v29 = vld [vmem:[#allocation8 + $0x14] sm:$0xf]  ;;  %2271 = vmatpush.bf16.msrb.mxu2 %v3437_v36  ;;  %v3541_v53 = vor.u32 %v3834_v49, %v3540_v48 }
 0x118   :  { %2248 = vmatmul.bf16.vlgmr.msrb.gmra.mxu0 %v4087_v27  ;;  %v1649_v61 = vadd.f32 %v1648_v56, %v1636_v51  ;;  %v3305_v26 = vor.u32 %v3773_v29, %v3302_v16  ;;  %v3508_v29 = vld [vmem:[#allocation8 + $0x1b0] sm:$0xf]  ;;  %v3826_v16 = vld [vmem:[#allocation8 + $0x1b4] sm:$0xf0] }
 0x119   :  { %2292 = vmatpush.bf16.msra.mxu0 %v3353_v15  ;;  %2279 = vmatpush.bf16.msrb.mxu3 %v3541_v53 }
 0x11a   :  { %vm1835_vm1 = vcmp.gt.f32.partialorder %v1649_v61, 0.0  ;;  %v1839_v1 = vmul.f32 0.2, %v1649_v61 }
 0x11b   :  { %2305 = vmatpush.bf16.msra.mxu1 %v3417_v19  ;;  %v3789_v19 = vld [vmem:[#allocation8 + $0x94] sm:$0xf] }
 0x11c   :  { %v1843_v8 = vsel %vm1835_vm1, %v1649_v61, %v1839_v1  ;;  %v3369_v30 = vor.u32 %v3789_v19, %v3366_v23  ;;  %v3809_v1 = vld [vmem:[#allocation8 + $0x134] sm:$0xf]  ;;  %v3509_v23 = vor.u32 %v3826_v16, %v3508_v29 }
 0x11d   :  { %2293 = vmatpush.bf16.msra.mxu0 %v3345_v28  ;;  %v4092_v9 = vpop.f32.mrf.mxu2  ;;  %v1847_v34 = vpack.c.bf16 %v1843_v8, %v1843_v8  ;;  %v1637_v15 = vpop.f32.mrf.mxu0  ;;  %v3771_v28 = vld [vmem:[#allocation8 + $0x4] sm:$0xf]  ;;  %2280 = vmatpush.bf16.msrb.mxu3 %v3533_v59 }
 0x11e   :  { %v3297_v37 = vor.u32 %v3771_v28, %v3294_v45  ;;  %v1662_v8 = vadd.f32 %v4092_v9, %v319_v22  ;;  %v3824_v9 = vld [vmem:[#allocation8 + $0x1a4] sm:$0xf0]  ;;  %v3803_v28 = vld [vmem:[#allocation8 + $0x104] sm:$0xf]  ;;  %v3422_v45 = vld [vmem:[#allocation8 + $0x108] sm:$0xf0] }
 0x11f   :  { %2306 = vmatpush.bf16.msra.mxu1 %v3409_v32  ;;  %v1650_v18 = vpop.f32.mrf.mxu1  ;;  %v3429_v32 = vor.u32 %v3806_v25, %v3428_v24  ;;  %v3500_v25 = vld [vmem:[#allocation8 + $0x1a0] sm:$0xf] }
 0x120   :  { %v4094_v14 = vpop.f32.mrf.mxu3  ;;  %2261 = vmatmul.bf16.vlgmr.msrb.gmra.mxu1 %v1847_v34  ;;  %v3430_v18 = vld [vmem:[#allocation8 + $0x118] sm:$0xf0] }
 0x121   :  { %2294 = vmatpush.bf16.msra.mxu0 %v3337_v38  ;;  %v3361_v38 = vor.u32 %v3787_v31, %v3358_v7  ;;  %2272 = vmatpush.bf16.msrb.mxu2 %v3429_v32  ;;  %v1675_v19 = vadd.f32 %v4094_v14, %v1662_v8  ;;  %v3501_v31 = vor.u32 %v3824_v9, %v3500_v25  ;;  %v3822_v14 = vld [vmem:[#allocation8 + $0x194] sm:$0xf0]  ;;  %v3494_v8 = vld [vmem:[#allocation8 + $0x198] sm:$0xf0] }
 0x122   :  { %2281 = vmatpush.bf16.msrb.mxu3 %v3525_v21  ;;  %v3425_v7 = vor.u32 %v3803_v28, %v3422_v45  ;;  %v3823_v21 = vld [vmem:[#allocation8 + $0x1a4] sm:$0xf] }
 0x123   :  { %2307 = vmatpush.bf16.msra.mxu1 %v3401_v44  ;;  %v3815_v44 = vld [vmem:[#allocation8 + $0x164] sm:$0xf] }
 0x124   :  { %v3473_v47 = vor.u32 %v3815_v44, %v3470_v46  ;;  %v3831_v46 = vld [vmem:[#allocation8 + $0x1e4] sm:$0xf] }
 0x125   :  { %2295 = vmatpush.bf16.msra.mxu0 %v3329_v55  ;;  %v1663_v33 = vpop.f32.mrf.mxu2  ;;  %2273 = vmatpush.bf16.msrb.mxu2 %v3421_v43  ;;  %v3465_v55 = vor.u32 %v3813_v52, %v3462_v54 }
 0x126   :  { %2282 = vmatpush.bf16.msrb.mxu3 %v3517_v11  ;;  %v3492_v33 = vld [vmem:[#allocation8 + $0x190] sm:$0xf] }
 0x127   :  { %2308 = vmatpush.bf16.msra.mxu1 %v3393_v58  ;;  %v3811_v58 = vld [vmem:[#allocation8 + $0x144] sm:$0xf]  ;;  %v3493_v35 = vor.u32 %v3822_v14, %v3492_v33  ;;  %v1914_v33 = vld [vmem:[%s4114_s4] sm:$0x3] }
 0x128   :  { %v1676_v42 = vpop.f32.mrf.mxu3 }
 0x129   :  { %2296 = vmatpush.bf16.msra.mxu0 %v3321_v63  ;;  %2318 = vmatpush.bf16.msra.mxu2 %v3481_v50  ;;  %v3820_v42 = vld [vmem:[#allocation8 + $0x184] sm:$0xf0] }
 0x12a   :  { %2283 = vmatpush.bf16.msrb.mxu3 %v3509_v23 }
 0x12b   :  { %2309 = vmatpush.bf16.msra.mxu1 %v3385_v2  ;;  %v3449_v2 = vor.u32 %v3809_v1, %v3446_v20  ;;  %v3502_v1 = vld [vmem:[#allocation8 + $0x1a8] sm:$0xf0] }
 0x12c   :  { %v3505_v3 = vor.u32 %v3823_v21, %v3502_v1 }
 0x12d   :  { %2297 = vmatpush.bf16.msra.mxu0 %v3313_v12  ;;  %2319 = vmatpush.bf16.msra.mxu2 %v3473_v47  ;;  %v3534_v47 = vld [vmem:[#allocation8 + $0x1e8] sm:$0xf0] }
 0x12e   :  { %2284 = vmatpush.bf16.msrb.mxu3 %v3501_v31  ;;  %v3537_v49 = vor.u32 %v3831_v46, %v3534_v47 }
 0x12f   :  { %2310 = vmatpush.bf16.msra.mxu1 %v3377_v17  ;;  %v3805_v17 = vld [vmem:[#allocation8 + $0x114] sm:$0xf] }
 0x130   :  { %v3433_v24 = vor.u32 %v3805_v17, %v3430_v18 }
 0x131   :  { %2298 = vmatpush.bf16.msra.mxu0 %v3305_v26  ;;  %2320 = vmatpush.bf16.msra.mxu2 %v3465_v55  ;;  %v3829_v55 = vld [vmem:[#allocation8 + $0x1d4] sm:$0xf] }
 0x132   :  { %2285 = vmatpush.bf16.msrb.mxu3 %v3493_v35  ;;  %v1916_v35 = vperm.slane %v1914_v33, 0 }
 0x133   :  { %2311 = vmatpush.bf16.msra.mxu1 %v3369_v30 }
 0x135   :  { %2299 = vmatpush.bf16.msra.mxu0 %v3297_v37  ;;  %v1687_v51 = vpop.f32.mrf.mxu0  ;;  %v3484_v37 = vld [vmem:[#allocation8 + $0x180] sm:$0xf] }
 0x136   :  { %v1688_v30 = vadd.f32 %v1687_v51, %v1675_v19  ;;  %v3485_v39 = vor.u32 %v3820_v42, %v3484_v37  ;;  %v3526_v51 = vld [vmem:[#allocation8 + $0x1d8] sm:$0xf0] }
 0x137   :  { %2312 = vmatpush.bf16.msra.mxu1 %v3361_v38  ;;  %v1700_v56 = vpop.f32.mrf.mxu1  ;;  %v3542_v38 = vld [vmem:[#allocation8 + $0x1f8] sm:$0xf0]  ;;  %v3529_v57 = vor.u32 %v3829_v55, %v3526_v51 }
 0x138   :  { %2300 = vmatmul.bf16.vlgmr.msra.gmra.mxu0 %v4087_v27  ;;  %v3457_v27 = vor.u32 %v3811_v58, %v3454_v60  ;;  %v1701_v32 = vadd.f32 %v1700_v56, %v1688_v30  ;;  %v3545_v43 = vor.u32 %v3833_v40, %v3542_v38  ;;  %2286 = vmatpush.bf16.msrb.mxu3 %v3485_v39  ;;  %v3827_v60 = vld [vmem:[#allocation8 + $0x1c4] sm:$0xf]  ;;  %v1917_v40 = vperm.slane %v1914_v33, 1 }
 0x13a   :  { %2313 = vmatmul.bf16.vlgmr.msra.gmra.mxu1 %v1847_v34  ;;  %2321 = vmatpush.bf16.msra.mxu2 %v3457_v27  ;;  %v3438_v34 = vld [vmem:[#allocation8 + $0x128] sm:$0xf0] }
 0x13b   :  { %v3441_v15 = vor.u32 %v3807_v6, %v3438_v34  ;;  %v3518_v27 = vld [vmem:[#allocation8 + $0x1c8] sm:$0xf0]  ;;  %v3821_v6 = vld [vmem:[#allocation8 + $0x194] sm:$0xf] }
 0x13c   :  { %2331 = vmatpush.bf16.msra.mxu3 %v3545_v43 }
 0x13d   :  { %v1713_v61 = vpop.f32.mrf.mxu2  ;;  %v1689_v10 = vpop.f32.mrf.mxu0 }
 0x13e   :  { %2322 = vmatpush.bf16.msra.mxu2 %v3449_v2  ;;  %v1714_v41 = vadd.f32 %v1713_v61, %v1701_v32  ;;  %v3521_v61 = vor.u32 %v3827_v60, %v3518_v27  ;;  %v3497_v10 = vor.u32 %v3821_v6, %v3494_v8 }
 0x13f   :  { %v1702_v12 = vpop.f32.mrf.mxu1 }
 0x140   :  { %v1726_v63 = vpop.f32.mrf.mxu3  ;;  %2332 = vmatpush.bf16.msra.mxu3 %v3537_v49  ;;  %v3819_v12 = vld [vmem:[#allocation8 + $0x184] sm:$0xf] }
 0x141   :  { %v1727_v50 = vadd.f32 %v1726_v63, %v1714_v41  ;;  %v3513_v63 = vor.u32 %v3825_v62, %v3510_v5 }
 0x142   :  { %2323 = vmatpush.bf16.msra.mxu2 %v3441_v15  ;;  %v3486_v15 = vld [vmem:[#allocation8 + $0x188] sm:$0xf0] }
 0x143   :  { %v3489_v29 = vor.u32 %v3819_v12, %v3486_v15 }
 0x144   :  { %2333 = vmatpush.bf16.msra.mxu3 %v3529_v57 }
 0x145   :  { %v1715_v36 = vpop.f32.mrf.mxu2 }
 0x146   :  { %2324 = vmatpush.bf16.msra.mxu2 %v3433_v24 }
 0x148   :  { %v1728_v26 = vpop.f32.mrf.mxu3  ;;  %2334 = vmatpush.bf16.msra.mxu3 %v3521_v61 }
 0x14a   :  { %2325 = vmatpush.bf16.msra.mxu2 %v3425_v7 }
 0x14c   :  { %2335 = vmatpush.bf16.msra.mxu3 %v3513_v63 }
 0x150   :  { %2336 = vmatpush.bf16.msra.mxu3 %v3505_v3 }
 0x154   :  { %2337 = vmatpush.bf16.msra.mxu3 %v3497_v10 }
 0x155   :  { %v1739_v44 = vpop.f32.mrf.mxu0 }
 0x156   :  { %v1740_v48 = vadd.f32 %v1739_v44, %v1727_v50 }
 0x157   :  { %v1752_v52 = vpop.f32.mrf.mxu1 }
 0x158   :  { %vm1836_vm2 = vcmp.gt.f32.partialorder %v1740_v48, 0.0  ;;  %v1840_v53 = vmul.f32 0.2, %v1740_v48  ;;  %v1753_v11 = vadd.f32 %v1752_v52, %v320_v4  ;;  %2338 = vmatpush.bf16.msra.mxu3 %v3489_v29 }
 0x15a   :  { %v1844_v54 = vsel %vm1836_vm2, %v1740_v48, %v1840_v53 }
 0x15b   :  { %v1848_v56 = vpack.c.bf16 %v1844_v54, %v1844_v54 }
 0x15d   :  { %v1765_v0 = vpop.f32.mrf.mxu2  ;;  %2274 = vmatmul.bf16.vlgmr.msrb.gmra.mxu2 %v1848_v56  ;;  %v1741_v59 = vpop.f32.mrf.mxu0 }
 0x15e   :  { %v1766_v34 = vadd.f32 %v1765_v0, %v1753_v11 }
 0x15f   :  { %v1754_v22 = vpop.f32.mrf.mxu1 }
 0x160   :  { %v1778_v58 = vpop.f32.mrf.mxu3 }
 0x161   :  { %v1779_v16 = vadd.f32 %v1778_v58, %v1766_v34  ;;  %v2350_v58 = vld [vmem:[%s4115_s5] sm:$0x3] }
 0x162   :  { %v2352_v27 = vperm.slane %v2350_v58, 0  ;;  %v2353_v22 = vperm.slane %v2350_v58, 1 }
 0x165   :  { %v1767_v20 = vpop.f32.mrf.mxu2 }
 0x168   :  { %v1780_v2 = vpop.f32.mrf.mxu3 }
 0x169   :  { %v3843_v2 = vld [vmem:[#allocation2] ss:$0 sm:$0xff] }
 0x16d   :  { %2326 = vmatmul.bf16.vlgmr.msra.gmra.mxu2 %v1848_v56 }
 0x175   :  { %v1791_v17 = vpop.f32.mrf.mxu0 }
 0x176   :  { %v1792_v19 = vadd.f32 %v1791_v17, %v1779_v16 }
 0x177   :  { %v1804_v18 = vpop.f32.mrf.mxu1 }
 0x178   :  { %v1805_v23 = vadd.f32 %v1804_v18, %v1792_v19 }
 0x17d   :  { %v1817_v36 = vpop.f32.mrf.mxu2  ;;  %v1793_v25 = vpop.f32.mrf.mxu0 }
 0x17e   :  { %v1818_v24 = vadd.f32 %v1817_v36, %v1805_v23  ;;  %v1830_v13 = vpop.f32.mrf.mxu3 }
 0x17f   :  { %v1806_v9 = vpop.f32.mrf.mxu1 }
 0x180   :  { %v1831_v26 = vadd.f32 %v1830_v13, %v1818_v24 }
 0x182   :  { %vm1837_vm3 = vcmp.gt.f32.partialorder %v1831_v26, 0.0  ;;  %v1841_v28 = vmul.f32 0.2, %v1831_v26 }
 0x184   :  { %v1845_v45 = vsel %vm1837_vm3, %v1831_v26, %v1841_v28 }
 0x185   :  { %v1849_v30 = vpack.c.bf16 %v1845_v45, %v1845_v45  ;;  %v1819_v31 = vpop.f32.mrf.mxu2 }
 0x186   :  { %v1832_v7 = vpop.f32.mrf.mxu3 }
 0x187   :  { %2287 = vmatmul.bf16.vlgmr.msrb.gmra.mxu3 %v1849_v30 }
 0x195   :  { %v2249_v32 = vpop.f32.mrf.mxu0 }
 0x196   :  { %v2250_v41 = vadd.f32 %v2249_v32, %v1916_v35 }
 0x197   :  { %2339 = vmatmul.bf16.vlgmr.msra.gmra.mxu3 %v1849_v30 }
 0x19d   :  { %v2251_v14 = vpop.f32.mrf.mxu0  ;;  %v2262_v37 = vpop.f32.mrf.mxu1 }
 0x19e   :  { %v2263_v42 = vadd.f32 %v2262_v37, %v2250_v41 }
 0x1a5   :  { %v2264_v39 = vpop.f32.mrf.mxu1 }
 0x1b5   :  { %v2301_v38 = vpop.f32.mrf.mxu0 }
 0x1b6   :  { %v2302_v43 = vadd.f32 %v2301_v38, %v1917_v40 }
 0x1b7   :  { %v2314_v50 = vpop.f32.mrf.mxu1 }
 0x1b8   :  { %v2315_v44 = vadd.f32 %v2314_v50, %v2302_v43 }
 0x1bd   :  { %v2303_v46 = vpop.f32.mrf.mxu0 }
 0x1bf   :  { %v2316_v47 = vpop.f32.mrf.mxu1 }
 0x1e0   :  { %v2275_v48 = vpop.f32.mrf.mxu2 }
 0x1e1   :  { %v2276_v51 = vadd.f32 %v2275_v48, %v2263_v42 }
 0x1e8   :  { %v2277_v49 = vpop.f32.mrf.mxu2 }
 0x1f0   :  { %v2327_v52 = vpop.f32.mrf.mxu2 }
 0x1f1   :  { %v2328_v57 = vadd.f32 %v2327_v52, %v2315_v44 }
 0x1f8   :  { %v2329_v53 = vpop.f32.mrf.mxu2 }
 0x20a   :  { %v2288_v54 = vpop.f32.mrf.mxu3 }
 0x20b   :  { %v2289_v56 = vadd.f32 %v2288_v54, %v2276_v51 }
 0x20d   :  { %v2346_v0 = vmul.f32 0.2, %v2289_v56  ;;  %vm2344_vm4 = vcmp.gt.f32.partialorder %v2289_v56, 0.0 }
 0x20f   :  { %v2348_v62 = vsel %vm2344_vm4, %v2289_v56, %v2346_v0 }
 0x210   :  { %v2356_v63 = vmul.f32 %v2352_v27, %v2348_v62 }
 0x212   :  { %v2290_v55 = vpop.f32.mrf.mxu3 }
 0x21a   :  { %v2340_v59 = vpop.f32.mrf.mxu3 }
 0x21b   :  { %v2341_v60 = vadd.f32 %v2340_v59, %v2328_v57 }
 0x21d   :  { %vm2345_vm5 = vcmp.gt.f32.partialorder %v2341_v60, 0.0  ;;  %v2347_v61 = vmul.f32 0.2, %v2341_v60 }
 0x21f   :  { %v2349_v5 = vsel %vm2345_vm5, %v2341_v60, %v2347_v61 }
 0x220   :  { %v2357_v21 = vmul.f32 %v2353_v22, %v2349_v5 }
 0x222   :  { %v2342_v1 = vpop.f32.mrf.mxu3  ;;  %v2358_v20 = vadd.f32 %v2357_v21, %v2356_v63 }
 0x224   :  { %2359 = vadd.xlane.f32.xlu0 %v2358_v20 }
 0x297   :  { %v2360_v3 = vpop.xlane.xlu0 %2359 }
 0x298   :  { %v2365_v4 = vadd.f32 %v3843_v2, %v2360_v3 }
 0x29a   :  { %v3546_v6 = vmul.f32 -1.442695, %v2365_v4 }
 0x29c   :  { %3844 = vpow2.f32 %v3546_v6 }
 0x2a2   :  { %v3845_v8 = vpop.eup %3844 }
 0x2a3   :  { %v2369_v10 = vadd.f32 1.0, %v3845_v8 }
 0x2a5   :  { %3846 = vrcp.f32 %v2369_v10  ;;  %v2381_v15 = vand.u32 2147483648, %v2369_v10  ;;  %v2379_v16 = vand.u32 2147483647, %v2369_v10  ;;  %vm2375_vm7 = vweird.f32 %v2369_v10 }
 0x2a7   :  { %v2382_v18 = vor.u32 1.1754944e-38, %v2381_v15  ;;  %vm2380_vm10 = vcmp.eq.f32.partialorder %v2379_v16, 8.507059e+37 }
 0x2ab   :  { %v3847_v11 = vpop.eup %3846 }
 0x2ac   :  { %v2371_v34 = vmul.f32 %v3847_v11, %v2369_v10  ;;  %vm2376_vm6 = vweird.f32 %v3847_v11 }
 0x2ad   :  { %vm2377_vm8 = vmor %vm2375_vm7, %vm2376_vm6 }
 0x2ae   :  { %v2372_v12 = vsub.f32 1.0, %v2371_v34 }
 0x2b0   :  { %v2373_v29 = vmul.f32 %v3847_v11, %v2372_v12 }
 0x2b2   :  { %v2374_v17 = vadd.f32 %v3847_v11, %v2373_v29 }
 0x2b4   :  { %v2378_v19 = vsel %vm2377_vm8, %v3847_v11, %v2374_v17 }
 0x2b5   :  { %v2383_v23 = vsel %vm2380_vm10, %v2382_v18, %v2378_v19 }
 0x2b6   :  { %2386 = vst.msk [vmem:[%s4117_s7] sm:$0xff] %vm2385_vm9, %v2383_v23 }
 0x2b7   :  { %2391 = vsyncpa [#allocation4], 1 }
 0x2b8   :  { %2392 = vsyncpa [#allocation6], 1 }
 0x2b9   :  { %2393 = vsyncpa [#allocation9], 1 }

</bundles_post_ra>
